<compile_context>
chip_gen: v5e
topology: v5e:2x2
jax: 0.10.0
libtpu: 0.0.40
codegen_flags: <defaults>
</compile_context>

<pallas_src>
import functools

import jax
import jax.numpy as jnp
from jax import lax
from jax.experimental import pallas as pl
from jax.experimental.pallas import tpu as pltpu


# ----------------------------------------------------------------------------- helpers
def _round_up(x, m):
    return (x + m - 1) // m * m


def _pad_last(a, target):
    pad = target - a.shape[-1]
    if pad == 0:
        return a
    return jnp.pad(a, [(0, 0)] * (a.ndim - 1) + [(0, pad)])


def _erf_poly(x):
    # Abramowitz & Stegun 7.1.26 polynomial erf (|err| < 1.5e-7); used instead of
    # lax.erf so the exact (erf-based) nn.GELU lowers cleanly inside Mosaic.
    a1, a2, a3, a4, a5 = 0.254829592, -0.284496736, 1.421413741, -1.453152027, 1.061405429
    p = 0.3275911
    s = jnp.where(x >= 0, 1.0, -1.0)
    ax = jnp.abs(x)
    t = pl.reciprocal(1.0 + p * ax, approx=True)  # EUP slot; ~free vs a VALU divide
    poly = ((((a5 * t + a4) * t + a3) * t + a2) * t + a1) * t
    return s * (1.0 - poly * jnp.exp(-ax * ax))


def _gelu_exact(x):
    # matches PyTorch nn.GELU() (default, erf-based)
    return 0.5 * x * (1.0 + _erf_poly(x * 0.7071067811865476))


# ----------------------------------------------------------------------------- downsample conv (4x4, stride 2, pad 1)
def _matmul_bias_kernel(a_ref, w_ref, b_ref, o_ref, acc_ref):
    @pl.when(pl.program_id(2) == 0)
    def _():
        acc_ref[...] = jnp.zeros_like(acc_ref)

    acc_ref[...] += jnp.dot(a_ref[...], w_ref[...], preferred_element_type=jnp.float32)

    @pl.when(pl.program_id(2) == pl.num_programs(2) - 1)
    def _():
        o_ref[...] = acc_ref[...] + b_ref[...]


def downsample_forward(x_nhwc, w_hwio, b):
    """Conv2d(Cin, Cout, kernel=4, stride=2, padding=1).

    im2col in XLA glue; tiled/gridded MXU matmul with K-axis accumulation in Pallas.
    Returns NHWC with channels zero-padded to a multiple of 128 (padded channels are
    exactly zero) so the downstream ResBlock kernels are lane-dense.
    """
    N, H, W, Cin = x_nhwc.shape
    Cout = w_hwio.shape[-1]
    OH, OW = H // 2, W // 2
    M, K = N * OH * OW, 16 * Cin
    Cp = _round_up(Cout, 128)

    # TODO(synk): patch extraction could move in-kernel (16 accumulating matmuls over
    # shifted slices) to remove the 16x im2col HBM amplification.
    xp = jnp.pad(x_nhwc, ((0, 0), (1, 1), (1, 1), (0, 0)))
    cols = [xp[:, kh:kh + 2 * OH:2, kw:kw + 2 * OW:2, :]
            for kh in range(4) for kw in range(4)]
    patches = jnp.stack(cols, axis=3).reshape(M, K)
    wmat = w_hwio.reshape(K, Cout)

    # MXU-friendly tiles (multiples of (8,128)); K/M padded with zeros.
    tm = min(256, _round_up(M, 8))
    tn = 256 if Cp % 256 == 0 else 128
    Kp = _round_up(K, 128)
    tk = 512 if Kp % 512 == 0 else (256 if Kp % 256 == 0 else 128)
    Mp = _round_up(M, tm)

    patches = jnp.pad(patches, ((0, Mp - M), (0, Kp - K)))
    wmat = jnp.pad(wmat, ((0, Kp - K), (0, Cp - Cout)))
    bias = _pad_last(b, Cp).reshape(1, Cp)

    out2 = pl.pallas_call(
        _matmul_bias_kernel,
        out_shape=jax.ShapeDtypeStruct((Mp, Cp), jnp.float32),
        grid=(Mp // tm, Cp // tn, Kp // tk),
        in_specs=[
            pl.BlockSpec((tm, tk), lambda i, j, k: (i, k)),
            pl.BlockSpec((tk, tn), lambda i, j, k: (k, j)),
            pl.BlockSpec((1, tn), lambda i, j, k: (0, j)),
        ],
        out_specs=pl.BlockSpec((tm, tn), lambda i, j, k: (i, j)),
        scratch_shapes=[pltpu.VMEM((tm, tn), jnp.float32)],
        compiler_params=pltpu.CompilerParams(
            dimension_semantics=("parallel", "parallel", "arbitrary"),
            vmem_limit_bytes=64 * 1024 * 1024),
        cost_estimate=pl.CostEstimate(
            flops=int(2 * Mp * Kp * Cp),
            transcendentals=0,
            bytes_accessed=int(4 * (Mp * Kp + Kp * Cp + Mp * Cp))),
    )(patches, wmat, bias)
    return out2[:M].reshape(N, OH, OW, Cp)


# ----------------------------------------------------------------------------- ResBlock kernel
def _resblock_kernel(xh_ref, res_ref, ss_ref, wdw_ref, cvec_ref, b1_ref,
                     w1_ref, w2_ref, out_ref, *, TH, S, C, Cp, Hp, HC, eps):
    # xh_ref : (1, TH+2, S+2, Cp) zero-padded halo window (TH rows + 1-row halo)
    # res_ref: (1, S, TH, Cp)     residual read at the transposed spatial position
    # ss_ref : (1, 2, Cp)         folded per-channel [scale, shift]
    # cvec   : (2, Cp)            [depthwise bias, gamma-folded second-linear bias]
    xp = xh_ref[0]

    # -- 3x3 depthwise conv: 3 column (sublane) shifts; row shifts are free offsets --
    d = None
    for kw in range(3):
        v = xp[:, kw:kw + S, :]                       # (TH+2, S, Cp)
        for kh in range(3):
            tap = v[kh:kh + TH] * wdw_ref[kh, kw]
            d = tap if d is None else d + tap
    d = d + cvec_ref[0]

    # -- LayerNorm over the real C channels (padded lanes of d are exactly zero) --
    inv_c = 1.0 / C
    mean = jnp.sum(d, axis=-1, keepdims=True) * inv_c
    ex2 = jnp.sum(d * d, axis=-1, keepdims=True) * inv_c
    xn = (d - mean) * lax.rsqrt(ex2 - mean * mean + eps)
    # folded (LN affine) * (gamma*w, beta*w) modulation -> single scale/shift per chan
    y = xn * ss_ref[0, 0] + ss_ref[0, 1]              # padded lanes -> exactly 0

    # -- channelwise MLP (bf16 MXU inputs, f32 accumulation), chunked over hidden --
    y2 = y.reshape(TH * S, Cp).astype(jnp.bfloat16)
    z2 = None
    for h0 in range(0, Hp, HC):
        h = jnp.dot(y2, w1_ref[:, h0:h0 + HC],
                    preferred_element_type=jnp.float32) + b1_ref[0, h0:h0 + HC]
        h = _gelu_exact(h).astype(jnp.bfloat16)
        part = jnp.dot(h, w2_ref[h0:h0 + HC, :], preferred_element_type=jnp.float32)
        z2 = part if z2 is None else z2 + part
    z = (z2 + cvec_ref[1]).reshape(TH, S, Cp)

    # -- residual add with the channel_to_first spatial transpose fused into the write --
    out_ref[0] = pltpu.einshape("ijc->jic", z) + res_ref[0]


def _pick_row_tile(s, target_pixels):
    # Row tiles must be multiples of 8 (sublane constraint on the transposed
    # output/residual blocks) and divide the spatial size.
    if s % 8 != 0:
        return s
    cands = [th for th in range(8, s + 1, 8) if s % th == 0]
    ok = [th for th in cands if th * s <= target_pixels]
    if ok:
        return max(ok)
    return min(cands) if cands else s


def resblock_forward(x_nhwc, c_vec, p, *, eps=1e-6, target_pixels=512):
    """One ResBlock on a channel-padded NHWC activation.

    target_pixels bounds the per-grid-step spatial working set (~rows*W); 512 suits
    v5e/v6e VMEM, use ~256 on v7x (64 MiB VMEM).
    """
    N, Hd, Wd, Cp = x_nhwc.shape
    assert Hd == Wd, "channel_to_first residual add requires square spatial dims"
    S = Hd
    C = p["bdw"].shape[0]
    hidden = p["w1"].shape[1]
    Hp = _round_up(hidden, 128)
    HC = 512 if Hp % 512 == 0 else (256 if Hp % 256 == 0 else 128)
    TH = _pick_row_tile(S, target_pixels)
    T = S // TH

    # --- parameter prep: lane-dense padding + algebraic folds (tiny XLA glue) ---
    padc = lambda a: _pad_last(a, Cp)
    wdw = padc(p["wdw"])                                           # (3,3,Cp)
    bdw = padc(p["bdw"])
    lnw, lnb = padc(p["lnw"]), padc(p["lnb"])
    gres = padc(p["gres"])
    b1 = _pad_last(p["b1"], Hp).reshape(1, Hp)
    w1 = _pad_last(jnp.pad(p["w1"], ((0, Cp - C), (0, 0))), Hp)     # (Cp, Hp)
    w2 = padc(jnp.pad(p["w2"], ((0, Hp - hidden), (0, 0))))         # (Hp, Cp)
    w1b = w1.astype(jnp.bfloat16)
    w2f = (w2 * gres[None, :]).astype(jnp.bfloat16)                 # fold ResBlock.gamma
    b2f = padc(p["b2"]) * gres
    cvec = jnp.stack([bdw, b2f], axis=0)                            # (2, Cp)

    # cond_linear + ModulatedLayerNorm affine/modulation -> per-channel scale & shift
    wv = c_vec @ padc(p["wcond"]) + padc(p["bcond"])                # (N, Cp)
    scale = p["mod"][0] * wv * lnw
    shift = p["mod"][0] * wv * lnb + p["mod"][1] * wv
    ss = jnp.stack([scale, shift], axis=1)                          # (N, 2, Cp)

    # --- pre-gathered halo row-windows: (N*T, TH+2, S+2, Cp) ---
    xpad = jnp.pad(x_nhwc, ((0, 0), (1, 1), (1, 1), (0, 0)))
    xh = jnp.stack([xpad[:, t * TH:t * TH + TH + 2] for t in range(T)], axis=1)
    xh = xh.reshape(N * T, TH + 2, S + 2, Cp)

    kernel = functools.partial(_resblock_kernel, TH=TH, S=S, C=C, Cp=Cp,
                               Hp=Hp, HC=HC, eps=eps)
    return pl.pallas_call(
        kernel,
        out_shape=jax.ShapeDtypeStruct((N, S, S, Cp), jnp.float32),
        grid=(N, T),
        in_specs=[
            pl.BlockSpec((1, TH + 2, S + 2, Cp), lambda n, t: (n * T + t, 0, 0, 0)),
            pl.BlockSpec((1, S, TH, Cp), lambda n, t: (n, 0, t, 0)),
            pl.BlockSpec((1, 2, Cp), lambda n, t: (n, 0, 0)),
            pl.BlockSpec((3, 3, Cp), lambda n, t: (0, 0, 0)),
            pl.BlockSpec((2, Cp), lambda n, t: (0, 0)),
            pl.BlockSpec((1, Hp), lambda n, t: (0, 0)),
            pl.BlockSpec((Cp, Hp), lambda n, t: (0, 0)),
            pl.BlockSpec((Hp, Cp), lambda n, t: (0, 0)),
        ],
        out_specs=pl.BlockSpec((1, S, TH, Cp), lambda n, t: (n, 0, t, 0)),
        compiler_params=pltpu.CompilerParams(
            dimension_semantics=("parallel", "parallel"),
            vmem_limit_bytes=64 * 1024 * 1024),
        cost_estimate=pl.CostEstimate(
            flops=int(N * S * S * (4 * Cp * Hp + 40 * Cp)),
            transcendentals=int(N * S * S * (Hp + 1)),
            bytes_accessed=int(4 * (N * T * (TH + 2) * (S + 2) * Cp
                                    + 2 * N * S * S * Cp) + 4 * Cp * Hp)),
    )(xh, x_nhwc, ss, wdw, cvec, b1, w1b, w2f)


# ----------------------------------------------------------------------------- DownBlock
def downblock_forward(x_nchw, c_nchw, params, *, target_pixels=512):
    x = jnp.transpose(x_nchw, (0, 2, 3, 1))                # NCHW -> NHWC
    if params["downsample"] is not None:
        w_ds, b_ds = params["downsample"]
        C = w_ds.shape[-1]
        x = downsample_forward(x, w_ds, b_ds)              # channel-padded NHWC
    else:
        C = params["res_blocks"][0]["bdw"].shape[0]
        x = _pad_last(x, _round_up(C, 128))
    N = x.shape[0]
    c_vec = c_nchw.reshape(N, -1)                          # conditioning is [N, cond, 1, 1]
    for bp in params["res_blocks"]:
        x = resblock_forward(x, c_vec, bp, target_pixels=target_pixels)
    return jnp.transpose(x[..., :C], (0, 3, 1, 2))         # NHWC -> NCHW (drop lane pad)


# ----------------------------------------------------------------------------- params (deterministic, synthetic)
def init_params(key, n, in_channels, out_channels, cond):
    C = out_channels
    hidden = 4 * C
    keys = jax.random.split(key, 1 + n)
    k1, k2 = jax.random.split(keys[0])
    params = {
        "downsample": (
            0.2 * jax.random.normal(k1, (4, 4, in_channels, C), jnp.float32),
            0.1 * jax.random.normal(k2, (C,), jnp.float32),
        ),
        "res_blocks": [],
    }
    for i in range(n):
        ks = jax.random.split(keys[1 + i], 12)
        params["res_blocks"].append({
            "wdw": 0.2 * jax.random.normal(ks[0], (3, 3, C), jnp.float32),
            "bdw": 0.1 * jax.random.normal(ks[1], (C,), jnp.float32),
            "wcond": 0.3 * jax.random.normal(ks[2], (cond, C), jnp.float32),
            "bcond": 0.1 * jax.random.normal(ks[3], (C,), jnp.float32),
            "lnw": jnp.ones((C,), jnp.float32) + 0.1 * jax.random.normal(ks[4], (C,), jnp.float32),
            "lnb": 0.1 * jax.random.normal(ks[5], (C,), jnp.float32),
            "mod": jax.random.normal(ks[6], (2,), jnp.float32),     # gamma, beta ~ torch.randn(1,1,1)
            "w1": 0.2 * jax.random.normal(ks[7], (C, hidden), jnp.float32),
            "b1": 0.1 * jax.random.normal(ks[8], (hidden,), jnp.float32),
            "w2": 0.2 * jax.random.normal(ks[9], (hidden, C), jnp.float32),
            "b2": 0.1 * jax.random.normal(ks[10], (C,), jnp.float32),
            "gres": 1e-6 * jnp.ones((C,), jnp.float32),             # as in ResBlock.__init__
        })
    return params


# ----------------------------------------------------------------------------- pure-JAX reference (PyTorch semantics, NCHW)
def ref_downblock(x, c, params):
    w_ds, b_ds = params["downsample"]
    w_oihw = jnp.transpose(w_ds, (3, 2, 0, 1))
    x = lax.conv_general_dilated(x, w_oihw, (2, 2), ((1, 1), (1, 1)),
                                 dimension_numbers=("NCHW", "OIHW", "NCHW"),
                                 precision=lax.Precision.HIGHEST)
    x = x + b_ds[None, :, None, None]
    N = x.shape[0]
    cv = c.reshape(N, -1)
    for p in params["res_blocks"]:
        residual = x
        wdw_oihw = jnp.transpose(p["wdw"], (2, 0, 1))[:, None, :, :]
        d = lax.conv_general_dilated(x, wdw_oihw, (1, 1), ((1, 1), (1, 1)),
                                     dimension_numbers=("NCHW", "OIHW", "NCHW"),
                                     feature_group_count=x.shape[1],
                                     precision=lax.Precision.HIGHEST)
        d = d + p["bdw"][None, :, None, None]
        s = cv @ p["wcond"] + p["bcond"]                       # [N, C]
        d_l = jnp.transpose(d, (0, 2, 3, 1))                   # channel_to_last
        mean = d_l.mean(-1, keepdims=True)
        var = ((d_l - mean) ** 2).mean(-1, keepdims=True)
        xn = (d_l - mean) / jnp.sqrt(var + 1e-6) * p["lnw"] + p["lnb"]
        w_b = s[:, None, None, :]
        y = p["mod"][0] * w_b * xn + p["mod"][1] * w_b
        h = jax.nn.gelu(y @ p["w1"] + p["b1"], approximate=False)
        z = h @ p["w2"] + p["b2"]
        z = p["gres"] * z
        x = jnp.transpose(z, (0, 3, 2, 1)) + residual          # channel_to_first + residual
    return x


# ----------------------------------------------------------------------------- main
if __name__ == "__main__":
    key = jax.random.PRNGKey(0)
    k_x, k_c, k_p = jax.random.split(key, 3)

    N, Cin, H, W = 2, 4, 16, 16
    Cout, cond, n_blocks = 8, 4, 2

    x = jax.random.normal(k_x, (N, Cin, H, W), jnp.float32)
    c = jax.random.normal(k_c, (N, cond, 1, 1), jnp.float32)
    params = init_params(k_p, n_blocks, Cin, Cout, cond)

    fwd = jax.jit(downblock_forward)
    out = jax.block_until_ready(fwd(x, c, params))
    assert out.shape == (N, Cout, H // 2, W // 2), out.shape

    ref = ref_downblock(x, c, params)
    err = float(jnp.max(jnp.abs(out - ref)))
    assert err < 2e-3, f"kernel/reference mismatch: max abs err = {err}"

    print("KERNEL_OK")
</pallas_src>

<mosaic_0001>
module attributes {stable_mosaic.version = 11 : i64} {
  func.func @_matmul_bias_kernel(%arg0: i32, %arg1: i32, %arg2: i32, %arg3: memref<128x128xf32, #tpu.memory_space<vmem>>, %arg4: memref<128x128xf32, #tpu.memory_space<vmem>>, %arg5: memref<1x128xf32, #tpu.memory_space<vmem>>, %arg6: memref<128x128xf32, #tpu.memory_space<vmem>>, %arg7: memref<128x128xf32, #tpu.memory_space<vmem>>) attributes {dimension_semantics = [#tpu.dimension_semantics<parallel>, #tpu.dimension_semantics<parallel>, #tpu.dimension_semantics<arbitrary>], iteration_bounds = array<i64: 1, 1, 1>, scalar_prefetch = 0 : i64, scratch_operands = 1 : i64, tpu.core_type = #tpu.core_type<tc>, window_params = [{transform_indices = @transform_0, window_bounds = array<i64: 128, 128>}, {transform_indices = @transform_1, window_bounds = array<i64: 128, 128>}, {transform_indices = @transform_2, window_bounds = array<i64: 1, 128>}, {transform_indices = @transform_3, window_bounds = array<i64: 128, 128>}]} {
    %c0_i32 = arith.constant 0 : i32
    %0 = arith.cmpi eq, %arg2, %c0_i32 : i32
    %1 = arith.extui %0 : i1 to i32
    %c0_i32_0 = arith.constant 0 : i32
    %2 = arith.cmpi ne, %1, %c0_i32_0 : i32
    scf.if %2 {
      %cst_10 = arith.constant 0.000000e+00 : f32
      %12 = vector.broadcast %cst_10 : f32 to vector<128x128xf32>
      %c0_11 = arith.constant 0 : index
      %c0_12 = arith.constant 0 : index
      %13 = vector.load %arg7[%c0_11, %c0_12] : memref<128x128xf32, #tpu.memory_space<vmem>>, vector<128x128xf32>
      tpu.vector_store %arg7[%c0_11, %c0_12], %12 {strides = array<i32>} : memref<128x128xf32, #tpu.memory_space<vmem>>, vector<128x128xf32>,
    } else {
    }
    %c0 = arith.constant 0 : index
    %c0_1 = arith.constant 0 : index
    %3 = vector.load %arg7[%c0, %c0_1] : memref<128x128xf32, #tpu.memory_space<vmem>>, vector<128x128xf32>
    %c0_2 = arith.constant 0 : index
    %c0_3 = arith.constant 0 : index
    %4 = vector.load %arg3[%c0_2, %c0_3] : memref<128x128xf32, #tpu.memory_space<vmem>>, vector<128x128xf32>
    %c0_4 = arith.constant 0 : index
    %c0_5 = arith.constant 0 : index
    %5 = vector.load %arg4[%c0_4, %c0_5] : memref<128x128xf32, #tpu.memory_space<vmem>>, vector<128x128xf32>
    %cst = arith.constant dense<0.000000e+00> : vector<128x128xf32>
    %6 = tpu.matmul %4, %5, %cst {dimension_numbers = #tpu.dot_dimension_numbers<[1], [0], [0], [1], [0, 0, 1, 1], [], []>} : vector<128x128xf32>, vector<128x128xf32>, vector<128x128xf32> -> vector<128x128xf32>
    %7 = arith.addf %3, %6 : vector<128x128xf32>
    %c0_6 = arith.constant 0 : index
    %c0_7 = arith.constant 0 : index
    %8 = vector.load %arg7[%c0_6, %c0_7] : memref<128x128xf32, #tpu.memory_space<vmem>>, vector<128x128xf32>
    tpu.vector_store %arg7[%c0_6, %c0_7], %7 {strides = array<i32>} : memref<128x128xf32, #tpu.memory_space<vmem>>, vector<128x128xf32>,
    %c0_i32_8 = arith.constant 0 : i32
    %9 = arith.cmpi eq, %arg2, %c0_i32_8 : i32
    %10 = arith.extui %9 : i1 to i32
    %c0_i32_9 = arith.constant 0 : i32
    %11 = arith.cmpi ne, %10, %c0_i32_9 : i32
    scf.if %11 {
      %c0_10 = arith.constant 0 : index
      %c0_11 = arith.constant 0 : index
      %12 = vector.load %arg7[%c0_10, %c0_11] : memref<128x128xf32, #tpu.memory_space<vmem>>, vector<128x128xf32>
      %c0_12 = arith.constant 0 : index
      %c0_13 = arith.constant 0 : index
      %13 = vector.load %arg5[%c0_12, %c0_13] : memref<1x128xf32, #tpu.memory_space<vmem>>, vector<1x128xf32>
      %14 = vector.broadcast %13 : vector<1x128xf32> to vector<128x128xf32>
      %15 = arith.addf %12, %14 : vector<128x128xf32>
      %c0_14 = arith.constant 0 : index
      %c0_15 = arith.constant 0 : index
      %16 = vector.load %arg6[%c0_14, %c0_15] : memref<128x128xf32, #tpu.memory_space<vmem>>, vector<128x128xf32>
      tpu.vector_store %arg6[%c0_14, %c0_15], %15 {strides = array<i32>} : memref<128x128xf32, #tpu.memory_space<vmem>>, vector<128x128xf32>,
    } else {
    }
    return
  }
  func.func @transform_0(%arg0: i32, %arg1: i32, %arg2: i32) -> (i32, i32) {
    %c0_i32 = arith.constant 0 : i32
    return %arg0, %arg2 : i32, i32
  }
  func.func @transform_1(%arg0: i32, %arg1: i32, %arg2: i32) -> (i32, i32) {
    %c0_i32 = arith.constant 0 : i32
    return %arg2, %arg1 : i32, i32
  }
  func.func @transform_2(%arg0: i32, %arg1: i32, %arg2: i32) -> (i32, i32) {
    %c0_i32 = arith.constant 0 : i32
    %c0_i32_0 = arith.constant 0 : i32
    return %c0_i32, %arg1 : i32, i32
  }
  func.func @transform_3(%arg0: i32, %arg1: i32, %arg2: i32) -> (i32, i32) {
    %c0_i32 = arith.constant 0 : i32
    return %arg0, %arg1 : i32, i32
  }
}

module attributes {stable_mosaic.version = 11 : i64} {
  func.func @_resblock_kernel(%arg0: i32, %arg1: i32, %arg2: memref<1x10x10x128xf32, #tpu.memory_space<vmem>>, %arg3: memref<1x8x8x128xf32, #tpu.memory_space<vmem>>, %arg4: memref<1x2x128xf32, #tpu.memory_space<vmem>>, %arg5: memref<3x3x128xf32, #tpu.memory_space<vmem>>, %arg6: memref<2x128xf32, #tpu.memory_space<vmem>>, %arg7: memref<1x128xf32, #tpu.memory_space<vmem>>, %arg8: memref<128x128xbf16, #tpu.memory_space<vmem>>, %arg9: memref<128x128xbf16, #tpu.memory_space<vmem>>, %arg10: memref<1x8x8x128xf32, #tpu.memory_space<vmem>>) attributes {dimension_semantics = [#tpu.dimension_semantics<parallel>, #tpu.dimension_semantics<parallel>], iteration_bounds = array<i64: 2, 1>, scalar_prefetch = 0 : i64, scratch_operands = 0 : i64, tpu.core_type = #tpu.core_type<tc>, window_params = [{transform_indices = @transform_0, window_bounds = array<i64: 1, 10, 10, 128>}, {transform_indices = @transform_1, window_bounds = array<i64: 1, 8, 8, 128>}, {transform_indices = @transform_2, window_bounds = array<i64: 1, 2, 128>}, {pipeline_mode = #tpu.pipeline_mode<synchronous>, transform_indices = @transform_3, window_bounds = array<i64: 3, 3, 128>}, {pipeline_mode = #tpu.pipeline_mode<synchronous>, transform_indices = @transform_4, window_bounds = array<i64: 2, 128>}, {pipeline_mode = #tpu.pipeline_mode<synchronous>, transform_indices = @transform_5, window_bounds = array<i64: 1, 128>}, {pipeline_mode = #tpu.pipeline_mode<synchronous>, transform_indices = @transform_6, window_bounds = array<i64: 128, 128>}, {pipeline_mode = #tpu.pipeline_mode<synchronous>, transform_indices = @transform_7, window_bounds = array<i64: 128, 128>}, {transform_indices = @transform_8, window_bounds = array<i64: 1, 8, 8, 128>}]} {
    %c0 = arith.constant 0 : index
    %c0_0 = arith.constant 0 : index
    %c0_1 = arith.constant 0 : index
    %c0_2 = arith.constant 0 : index
    %0 = vector.load %arg2[%c0, %c0_0, %c0_1, %c0_2] : memref<1x10x10x128xf32, #tpu.memory_space<vmem>>, vector<1x10x10x128xf32>
    %1 = vector.shape_cast %0 : vector<1x10x10x128xf32> to vector<10x10x128xf32>
    %2 = vector.extract_strided_slice %1 {offsets = [0, 0, 0], sizes = [10, 8, 128], strides = [1, 1, 1]} : vector<10x10x128xf32> to vector<10x8x128xf32>
    %3 = vector.extract_strided_slice %2 {offsets = [0, 0, 0], sizes = [8, 8, 128], strides = [1, 1, 1]} : vector<10x8x128xf32> to vector<8x8x128xf32>
    %c0_3 = arith.constant 0 : index
    %c0_4 = arith.constant 0 : index
    %c0_5 = arith.constant 0 : index
    %4 = vector.load %arg5[%c0_3, %c0_4, %c0_5] : memref<3x3x128xf32, #tpu.memory_space<vmem>>, vector<1x1x128xf32>
    %5 = vector.shape_cast %4 : vector<1x1x128xf32> to vector<128xf32>
    %6 = vector.shape_cast %5 : vector<128xf32> to vector<1x1x128xf32>
    %7 = vector.broadcast %6 : vector<1x1x128xf32> to vector<8x8x128xf32>
    %8 = arith.mulf %3, %7 : vector<8x8x128xf32>
    %9 = vector.extract_strided_slice %2 {offsets = [1, 0, 0], sizes = [8, 8, 128], strides = [1, 1, 1]} : vector<10x8x128xf32> to vector<8x8x128xf32>
    %c1 = arith.constant 1 : index
    %c0_6 = arith.constant 0 : index
    %c0_7 = arith.constant 0 : index
    %10 = vector.load %arg5[%c1, %c0_6, %c0_7] : memref<3x3x128xf32, #tpu.memory_space<vmem>>, vector<1x1x128xf32>
    %11 = vector.shape_cast %10 : vector<1x1x128xf32> to vector<128xf32>
    %12 = vector.shape_cast %11 : vector<128xf32> to vector<1x1x128xf32>
    %13 = vector.broadcast %12 : vector<1x1x128xf32> to vector<8x8x128xf32>
    %14 = arith.mulf %9, %13 : vector<8x8x128xf32>
    %15 = arith.addf %8, %14 : vector<8x8x128xf32>
    %16 = vector.extract_strided_slice %2 {offsets = [2, 0, 0], sizes = [8, 8, 128], strides = [1, 1, 1]} : vector<10x8x128xf32> to vector<8x8x128xf32>
    %c2 = arith.constant 2 : index
    %c0_8 = arith.constant 0 : index
    %c0_9 = arith.constant 0 : index
    %17 = vector.load %arg5[%c2, %c0_8, %c0_9] : memref<3x3x128xf32, #tpu.memory_space<vmem>>, vector<1x1x128xf32>
    %18 = vector.shape_cast %17 : vector<1x1x128xf32> to vector<128xf32>
    %19 = vector.shape_cast %18 : vector<128xf32> to vector<1x1x128xf32>
    %20 = vector.broadcast %19 : vector<1x1x128xf32> to vector<8x8x128xf32>
    %21 = arith.mulf %16, %20 : vector<8x8x128xf32>
    %22 = arith.addf %15, %21 : vector<8x8x128xf32>
    %23 = vector.extract_strided_slice %1 {offsets = [0, 1, 0], sizes = [10, 8, 128], strides = [1, 1, 1]} : vector<10x10x128xf32> to vector<10x8x128xf32>
    %24 = vector.extract_strided_slice %23 {offsets = [0, 0, 0], sizes = [8, 8, 128], strides = [1, 1, 1]} : vector<10x8x128xf32> to vector<8x8x128xf32>
    %c0_10 = arith.constant 0 : index
    %c1_11 = arith.constant 1 : index
    %c0_12 = arith.constant 0 : index
    %25 = vector.load %arg5[%c0_10, %c1_11, %c0_12] : memref<3x3x128xf32, #tpu.memory_space<vmem>>, vector<1x1x128xf32>
    %26 = vector.shape_cast %25 : vector<1x1x128xf32> to vector<128xf32>
    %27 = vector.shape_cast %26 : vector<128xf32> to vector<1x1x128xf32>
    %28 = vector.broadcast %27 : vector<1x1x128xf32> to vector<8x8x128xf32>
    %29 = arith.mulf %24, %28 : vector<8x8x128xf32>
    %30 = arith.addf %22, %29 : vector<8x8x128xf32>
    %31 = vector.extract_strided_slice %23 {offsets = [1, 0, 0], sizes = [8, 8, 128], strides = [1, 1, 1]} : vector<10x8x128xf32> to vector<8x8x128xf32>
    %c1_13 = arith.constant 1 : index
    %c1_14 = arith.constant 1 : index
    %c0_15 = arith.constant 0 : index
    %32 = vector.load %arg5[%c1_13, %c1_14, %c0_15] : memref<3x3x128xf32, #tpu.memory_space<vmem>>, vector<1x1x128xf32>
    %33 = vector.shape_cast %32 : vector<1x1x128xf32> to vector<128xf32>
    %34 = vector.shape_cast %33 : vector<128xf32> to vector<1x1x128xf32>
    %35 = vector.broadcast %34 : vector<1x1x128xf32> to vector<8x8x128xf32>
    %36 = arith.mulf %31, %35 : vector<8x8x128xf32>
    %37 = arith.addf %30, %36 : vector<8x8x128xf32>
    %38 = vector.extract_strided_slice %23 {offsets = [2, 0, 0], sizes = [8, 8, 128], strides = [1, 1, 1]} : vector<10x8x128xf32> to vector<8x8x128xf32>
    %c2_16 = arith.constant 2 : index
    %c1_17 = arith.constant 1 : index
    %c0_18 = arith.constant 0 : index
    %39 = vector.load %arg5[%c2_16, %c1_17, %c0_18] : memref<3x3x128xf32, #tpu.memory_space<vmem>>, vector<1x1x128xf32>
    %40 = vector.shape_cast %39 : vector<1x1x128xf32> to vector<128xf32>
    %41 = vector.shape_cast %40 : vector<128xf32> to vector<1x1x128xf32>
    %42 = vector.broadcast %41 : vector<1x1x128xf32> to vector<8x8x128xf32>
    %43 = arith.mulf %38, %42 : vector<8x8x128xf32>
    %44 = arith.addf %37, %43 : vector<8x8x128xf32>
    %45 = vector.extract_strided_slice %1 {offsets = [0, 2, 0], sizes = [10, 8, 128], strides = [1, 1, 1]} : vector<10x10x128xf32> to vector<10x8x128xf32>
    %46 = vector.extract_strided_slice %45 {offsets = [0, 0, 0], sizes = [8, 8, 128], strides = [1, 1, 1]} : vector<10x8x128xf32> to vector<8x8x128xf32>
    %c0_19 = arith.constant 0 : index
    %c2_20 = arith.constant 2 : index
    %c0_21 = arith.constant 0 : index
    %47 = vector.load %arg5[%c0_19, %c2_20, %c0_21] : memref<3x3x128xf32, #tpu.memory_space<vmem>>, vector<1x1x128xf32>
    %48 = vector.shape_cast %47 : vector<1x1x128xf32> to vector<128xf32>
    %49 = vector.shape_cast %48 : vector<128xf32> to vector<1x1x128xf32>
    %50 = vector.broadcast %49 : vector<1x1x128xf32> to vector<8x8x128xf32>
    %51 = arith.mulf %46, %50 : vector<8x8x128xf32>
    %52 = arith.addf %44, %51 : vector<8x8x128xf32>
    %53 = vector.extract_strided_slice %45 {offsets = [1, 0, 0], sizes = [8, 8, 128], strides = [1, 1, 1]} : vector<10x8x128xf32> to vector<8x8x128xf32>
    %c1_22 = arith.constant 1 : index
    %c2_23 = arith.constant 2 : index
    %c0_24 = arith.constant 0 : index
    %54 = vector.load %arg5[%c1_22, %c2_23, %c0_24] : memref<3x3x128xf32, #tpu.memory_space<vmem>>, vector<1x1x128xf32>
    %55 = vector.shape_cast %54 : vector<1x1x128xf32> to vector<128xf32>
    %56 = vector.shape_cast %55 : vector<128xf32> to vector<1x1x128xf32>
    %57 = vector.broadcast %56 : vector<1x1x128xf32> to vector<8x8x128xf32>
    %58 = arith.mulf %53, %57 : vector<8x8x128xf32>
    %59 = arith.addf %52, %58 : vector<8x8x128xf32>
    %60 = vector.extract_strided_slice %45 {offsets = [2, 0, 0], sizes = [8, 8, 128], strides = [1, 1, 1]} : vector<10x8x128xf32> to vector<8x8x128xf32>
    %c2_25 = arith.constant 2 : index
    %c2_26 = arith.constant 2 : index
    %c0_27 = arith.constant 0 : index
    %61 = vector.load %arg5[%c2_25, %c2_26, %c0_27] : memref<3x3x128xf32, #tpu.memory_space<vmem>>, vector<1x1x128xf32>
    %62 = vector.shape_cast %61 : vector<1x1x128xf32> to vector<128xf32>
    %63 = vector.shape_cast %62 : vector<128xf32> to vector<1x1x128xf32>
    %64 = vector.broadcast %63 : vector<1x1x128xf32> to vector<8x8x128xf32>
    %65 = arith.mulf %60, %64 : vector<8x8x128xf32>
    %66 = arith.addf %59, %65 : vector<8x8x128xf32>
    %c0_28 = arith.constant 0 : index
    %c0_29 = arith.constant 0 : index
    %67 = vector.load %arg6[%c0_28, %c0_29] : memref<2x128xf32, #tpu.memory_space<vmem>>, vector<1x128xf32>
    %68 = vector.shape_cast %67 : vector<1x128xf32> to vector<128xf32>
    %69 = vector.shape_cast %68 : vector<128xf32> to vector<1x1x128xf32>
    %70 = vector.broadcast %69 : vector<1x1x128xf32> to vector<8x8x128xf32>
    %71 = arith.addf %66, %70 : vector<8x8x128xf32>
    %cst = arith.constant dense<0.000000e+00> : vector<8x8xf32>
    %72 = vector.multi_reduction <add>, %71, %cst [2] : vector<8x8x128xf32> to vector<8x8xf32>
    %73 = vector.shape_cast %72 : vector<8x8xf32> to vector<8x8x1xf32>
    %cst_30 = arith.constant 1.250000e-01 : f32
    %74 = vector.broadcast %cst_30 : f32 to vector<8x8x1xf32>
    %75 = arith.mulf %73, %74 : vector<8x8x1xf32>
    %76 = arith.mulf %71, %71 : vector<8x8x128xf32>
    %cst_31 = arith.constant dense<0.000000e+00> : vector<8x8xf32>
    %77 = vector.multi_reduction <add>, %76, %cst_31 [2] : vector<8x8x128xf32> to vector<8x8xf32>
    %78 = vector.shape_cast %77 : vector<8x8xf32> to vector<8x8x1xf32>
    %cst_32 = arith.constant 1.250000e-01 : f32
    %79 = vector.broadcast %cst_32 : f32 to vector<8x8x1xf32>
    %80 = arith.mulf %78, %79 : vector<8x8x1xf32>
    %81 = vector.broadcast %75 : vector<8x8x1xf32> to vector<8x8x128xf32>
    %82 = arith.subf %71, %81 : vector<8x8x128xf32>
    %83 = arith.mulf %75, %75 : vector<8x8x1xf32>
    %84 = arith.subf %80, %83 : vector<8x8x1xf32>
    %cst_33 = arith.constant 9.99999997E-7 : f32
    %85 = vector.broadcast %cst_33 : f32 to vector<8x8x1xf32>
    %86 = arith.addf %84, %85 : vector<8x8x1xf32>
    %87 = math.rsqrt %86 : vector<8x8x1xf32>
    %88 = vector.broadcast %87 : vector<8x8x1xf32> to vector<8x8x128xf32>
    %89 = arith.mulf %82, %88 : vector<8x8x128xf32>
    %c0_34 = arith.constant 0 : index
    %c0_35 = arith.constant 0 : index
    %c0_36 = arith.constant 0 : index
    %90 = vector.load %arg4[%c0_34, %c0_35, %c0_36] : memref<1x2x128xf32, #tpu.memory_space<vmem>>, vector<1x1x128xf32>
    %91 = vector.shape_cast %90 : vector<1x1x128xf32> to vector<128xf32>
    %92 = vector.shape_cast %91 : vector<128xf32> to vector<1x1x128xf32>
    %93 = vector.broadcast %92 : vector<1x1x128xf32> to vector<8x8x128xf32>
    %94 = arith.mulf %89, %93 : vector<8x8x128xf32>
    %c0_37 = arith.constant 0 : index
    %c1_38 = arith.constant 1 : index
    %c0_39 = arith.constant 0 : index
    %95 = vector.load %arg4[%c0_37, %c1_38, %c0_39] : memref<1x2x128xf32, #tpu.memory_space<vmem>>, vector<1x1x128xf32>
    %96 = vector.shape_cast %95 : vector<1x1x128xf32> to vector<128xf32>
    %97 = vector.shape_cast %96 : vector<128xf32> to vector<1x1x128xf32>
    %98 = vector.broadcast %97 : vector<1x1x128xf32> to vector<8x8x128xf32>
    %99 = arith.addf %94, %98 : vector<8x8x128xf32>
    %100 = vector.shape_cast %99 : vector<8x8x128xf32> to vector<64x128xf32>
    %101 = arith.truncf %100 : vector<64x128xf32> to vector<64x128xbf16>
    %c0_40 = arith.constant 0 : index
    %c0_41 = arith.constant 0 : index
    %102 = vector.load %arg8[%c0_40, %c0_41] : memref<128x128xbf16, #tpu.memory_space<vmem>>, vector<128x128xbf16>
    %cst_42 = arith.constant dense<0.000000e+00> : vector<64x128xf32>
    %103 = tpu.matmul %101, %102, %cst_42 {dimension_numbers = #tpu.dot_dimension_numbers<[1], [0], [0], [1], [0, 0, 1, 1], [], []>} : vector<64x128xbf16>, vector<128x128xbf16>, vector<64x128xf32> -> vector<64x128xf32>
    %c0_43 = arith.constant 0 : index
    %c0_44 = arith.constant 0 : index
    %104 = vector.load %arg7[%c0_43, %c0_44] : memref<1x128xf32, #tpu.memory_space<vmem>>, vector<1x128xf32>
    %105 = vector.shape_cast %104 : vector<1x128xf32> to vector<128xf32>
    %106 = vector.shape_cast %105 : vector<128xf32> to vector<1x128xf32>
    %107 = vector.broadcast %106 : vector<1x128xf32> to vector<64x128xf32>
    %108 = arith.addf %103, %107 : vector<64x128xf32>
    %cst_45 = arith.constant 5.000000e-01 : f32
    %109 = vector.broadcast %cst_45 : f32 to vector<64x128xf32>
    %110 = arith.mulf %109, %108 : vector<64x128xf32>
    %cst_46 = arith.constant 0.707106769 : f32
    %111 = vector.broadcast %cst_46 : f32 to vector<64x128xf32>
    %112 = arith.mulf %108, %111 : vector<64x128xf32>
    %cst_47 = arith.constant 0.000000e+00 : f32
    %113 = vector.broadcast %cst_47 : f32 to vector<64x128xf32>
    %114 = arith.cmpf oge, %112, %113 : vector<64x128xf32>
    %cst_48 = arith.constant 1.000000e+00 : f32
    %cst_49 = arith.constant -1.000000e+00 : f32
    %115 = vector.broadcast %cst_48 : f32 to vector<64x128xf32>
    %116 = vector.broadcast %cst_49 : f32 to vector<64x128xf32>
    %117 = arith.select %114, %115, %116 : vector<64x128xi1>, vector<64x128xf32>
    %118 = math.absf %112 : vector<64x128xf32>
    %cst_50 = arith.constant 0.327591091 : f32
    %119 = vector.broadcast %cst_50 : f32 to vector<64x128xf32>
    %120 = arith.mulf %119, %118 : vector<64x128xf32>
    %cst_51 = arith.constant 1.000000e+00 : f32
    %121 = vector.broadcast %cst_51 : f32 to vector<64x128xf32>
    %122 = arith.addf %121, %120 : vector<64x128xf32>
    %123 = tpu.reciprocal %122 {approx = true} : vector<64x128xf32> -> vector<64x128xf32>
    %cst_52 = arith.constant 1.06140542 : f32
    %124 = vector.broadcast %cst_52 : f32 to vector<64x128xf32>
    %125 = arith.mulf %124, %123 : vector<64x128xf32>
    %cst_53 = arith.constant -1.45315206 : f32
    %126 = vector.broadcast %cst_53 : f32 to vector<64x128xf32>
    %127 = arith.addf %125, %126 : vector<64x128xf32>
    %128 = arith.mulf %127, %123 : vector<64x128xf32>
    %cst_54 = arith.constant 1.42141378 : f32
    %129 = vector.broadcast %cst_54 : f32 to vector<64x128xf32>
    %130 = arith.addf %128, %129 : vector<64x128xf32>
    %131 = arith.mulf %130, %123 : vector<64x128xf32>
    %cst_55 = arith.constant -0.284496725 : f32
    %132 = vector.broadcast %cst_55 : f32 to vector<64x128xf32>
    %133 = arith.addf %131, %132 : vector<64x128xf32>
    %134 = arith.mulf %133, %123 : vector<64x128xf32>
    %cst_56 = arith.constant 0.254829586 : f32
    %135 = vector.broadcast %cst_56 : f32 to vector<64x128xf32>
    %136 = arith.addf %134, %135 : vector<64x128xf32>
    %137 = arith.mulf %136, %123 : vector<64x128xf32>
    %cst_57 = arith.constant 0.000000e+00 : f32
    %138 = vector.broadcast %cst_57 : f32 to vector<64x128xf32>
    %139 = arith.subf %138, %118 : vector<64x128xf32>
    %140 = arith.mulf %139, %118 : vector<64x128xf32>
    %141 = math.exp %140 : vector<64x128xf32>
    %142 = arith.mulf %137, %141 : vector<64x128xf32>
    %cst_58 = arith.constant 1.000000e+00 : f32
    %143 = vector.broadcast %cst_58 : f32 to vector<64x128xf32>
    %144 = arith.subf %143, %142 : vector<64x128xf32>
    %145 = arith.mulf %117, %144 : vector<64x128xf32>
    %cst_59 = arith.constant 1.000000e+00 : f32
    %146 = vector.broadcast %cst_59 : f32 to vector<64x128xf32>
    %147 = arith.addf %146, %145 : vector<64x128xf32>
    %148 = arith.mulf %110, %147 : vector<64x128xf32>
    %149 = arith.truncf %148 : vector<64x128xf32> to vector<64x128xbf16>
    %c0_60 = arith.constant 0 : index
    %c0_61 = arith.constant 0 : index
    %150 = vector.load %arg9[%c0_60, %c0_61] : memref<128x128xbf16, #tpu.memory_space<vmem>>, vector<128x128xbf16>
    %cst_62 = arith.constant dense<0.000000e+00> : vector<64x128xf32>
    %151 = tpu.matmul %149, %150, %cst_62 {dimension_numbers = #tpu.dot_dimension_numbers<[1], [0], [0], [1], [0, 0, 1, 1], [], []>} : vector<64x128xbf16>, vector<128x128xbf16>, vector<64x128xf32> -> vector<64x128xf32>
    %c1_63 = arith.constant 1 : index
    %c0_64 = arith.constant 0 : index
    %152 = vector.load %arg6[%c1_63, %c0_64] : memref<2x128xf32, #tpu.memory_space<vmem>>, vector<1x128xf32>
    %153 = vector.shape_cast %152 : vector<1x128xf32> to vector<128xf32>
    %154 = vector.shape_cast %153 : vector<128xf32> to vector<1x128xf32>
    %155 = vector.broadcast %154 : vector<1x128xf32> to vector<64x128xf32>
    %156 = arith.addf %151, %155 : vector<64x128xf32>
    %157 = vector.shape_cast %156 : vector<64x128xf32> to vector<8x8x128xf32>
    %158 = tpu.transpose %157, [1, 0, 2] : vector<8x8x128xf32> -> vector<8x8x128xf32>
    %c0_65 = arith.constant 0 : index
    %c0_66 = arith.constant 0 : index
    %c0_67 = arith.constant 0 : index
    %c0_68 = arith.constant 0 : index
    %159 = vector.load %arg3[%c0_65, %c0_66, %c0_67, %c0_68] : memref<1x8x8x128xf32, #tpu.memory_space<vmem>>, vector<1x8x8x128xf32>
    %160 = vector.shape_cast %159 : vector<1x8x8x128xf32> to vector<8x8x128xf32>
    %161 = arith.addf %158, %160 : vector<8x8x128xf32>
    %c0_69 = arith.constant 0 : index
    %c0_70 = arith.constant 0 : index
    %c0_71 = arith.constant 0 : index
    %c0_72 = arith.constant 0 : index
    %162 = vector.load %arg10[%c0_69, %c0_70, %c0_71, %c0_72] : memref<1x8x8x128xf32, #tpu.memory_space<vmem>>, vector<1x8x8x128xf32>
    %163 = vector.shape_cast %162 : vector<1x8x8x128xf32> to vector<8x8x128xf32>
    %164 = vector.shape_cast %161 : vector<8x8x128xf32> to vector<1x8x8x128xf32>
    tpu.vector_store %arg10[%c0_69, %c0_70, %c0_71, %c0_72], %164 {strides = array<i32>} : memref<1x8x8x128xf32, #tpu.memory_space<vmem>>, vector<1x8x8x128xf32>,
    return
  }
  func.func @transform_0(%arg0: i32, %arg1: i32) -> (i32, i32, i32, i32) {
    %c1_i32 = arith.constant 1 : i32
    %0 = arith.muli %arg0, %c1_i32 : i32
    %1 = arith.addi %0, %arg1 : i32
    %c0_i32 = arith.constant 0 : i32
    %c0_i32_0 = arith.constant 0 : i32
    %c0_i32_1 = arith.constant 0 : i32
    %c0_i32_2 = arith.constant 0 : i32
    return %1, %c0_i32, %c0_i32_0, %c0_i32_1 : i32, i32, i32, i32
  }
  func.func @transform_1(%arg0: i32, %arg1: i32) -> (i32, i32, i32, i32) {
    %c0_i32 = arith.constant 0 : i32
    %c0_i32_0 = arith.constant 0 : i32
    %c0_i32_1 = arith.constant 0 : i32
    return %arg0, %c0_i32, %arg1, %c0_i32_0 : i32, i32, i32, i32
  }
  func.func @transform_2(%arg0: i32, %arg1: i32) -> (i32, i32, i32) {
    %c0_i32 = arith.constant 0 : i32
    %c0_i32_0 = arith.constant 0 : i32
    %c0_i32_1 = arith.constant 0 : i32
    return %arg0, %c0_i32, %c0_i32_0 : i32, i32, i32
  }
  func.func @transform_3(%arg0: i32, %arg1: i32) -> (i32, i32, i32) {
    %c0_i32 = arith.constant 0 : i32
    %c0_i32_0 = arith.constant 0 : i32
    %c0_i32_1 = arith.constant 0 : i32
    %c0_i32_2 = arith.constant 0 : i32
    return %c0_i32, %c0_i32_0, %c0_i32_1 : i32, i32, i32
  }
  func.func @transform_4(%arg0: i32, %arg1: i32) -> (i32, i32) {
    %c0_i32 = arith.constant 0 : i32
    %c0_i32_0 = arith.constant 0 : i32
    %c0_i32_1 = arith.constant 0 : i32
    return %c0_i32, %c0_i32_0 : i32, i32
  }
  func.func @transform_5(%arg0: i32, %arg1: i32) -> (i32, i32) {
    %c0_i32 = arith.constant 0 : i32
    %c0_i32_0 = arith.constant 0 : i32
    %c0_i32_1 = arith.constant 0 : i32
    return %c0_i32, %c0_i32_0 : i32, i32
  }
  func.func @transform_6(%arg0: i32, %arg1: i32) -> (i32, i32) {
    %c0_i32 = arith.constant 0 : i32
    %c0_i32_0 = arith.constant 0 : i32
    %c0_i32_1 = arith.constant 0 : i32
    return %c0_i32, %c0_i32_0 : i32, i32
  }
  func.func @transform_7(%arg0: i32, %arg1: i32) -> (i32, i32) {
    %c0_i32 = arith.constant 0 : i32
    %c0_i32_0 = arith.constant 0 : i32
    %c0_i32_1 = arith.constant 0 : i32
    return %c0_i32, %c0_i32_0 : i32, i32
  }
  func.func @transform_8(%arg0: i32, %arg1: i32) -> (i32, i32, i32, i32) {
    %c0_i32 = arith.constant 0 : i32
    %c0_i32_0 = arith.constant 0 : i32
    %c0_i32_1 = arith.constant 0 : i32
    return %arg0, %c0_i32, %arg1, %c0_i32_0 : i32, i32, i32, i32
  }
}

</mosaic_0001>

<bundles_post_ra>
// kernel: downblock_forward.3
= control target key start
LH: loop header
LB: loop body
LE: loop exit
PB: predicated region body
PF: predicated region fallthrough
CT: control target
= control target key end

     0   :  { %s454_s1 = inlined_call_operand.vmem [shape: f32[128,128], index: 1, kind: input, shape index: {}]   ;;  %s455_s2 = inlined_call_operand.vmem [shape: f32[1,128], index: 2, kind: input, shape index: {}]   ;;  %s456_s0 = inlined_call_operand.vmem [shape: f32[128,128], index: 0, kind: input, shape index: {}]   ;;  %s457_s3 = inlined_call_operand.vmem [shape: f32[128,128], index: 3, kind: output, shape index: {}]  }
   0x1   :  { %v81_v0 = vld [vmem:[%s454_s1 + $0x78] sm:$0xff]  ;;  %v80_v1 = vld [vmem:[%s454_s1 + $0x70] sm:$0xff]  ;;  %v79_v2 = vld [vmem:[%s454_s1 + $0x68] sm:$0xff] }
   0x2   :  { %239 = vmatpush.msra.mxu2 %v81_v0  ;;  %240 = vmatpush.msra.mxu3 %v81_v0  ;;  %v78_v3 = vld [vmem:[%s454_s1 + $0x60] sm:$0xff]  ;;  %v77_v4 = vld [vmem:[%s454_s1 + $0x58] sm:$0xff]  ;;  %v76_v5 = vld [vmem:[%s454_s1 + $0x50] sm:$0xff] }
   0x3   :  { %82 = vmatpush.msra.mxu0 %v81_v0  ;;  %238 = vmatpush.msra.mxu1 %v81_v0  ;;  %v75_v6 = vld [vmem:[%s454_s1 + $0x48] sm:$0xff]  ;;  %v74_v7 = vld [vmem:[%s454_s1 + $0x40] sm:$0xff]  ;;  %v73_v8 = vld [vmem:[%s454_s1 + $0x38] sm:$0xff] }
   0x4   :  { %242 = vmatpush.msra.mxu2 %v80_v1  ;;  %243 = vmatpush.msra.mxu3 %v80_v1  ;;  %v72_v9 = vld [vmem:[%s454_s1 + $0x30] sm:$0xff]  ;;  %v71_v10 = vld [vmem:[%s454_s1 + $0x28] sm:$0xff]  ;;  %v70_v11 = vld [vmem:[%s454_s1 + $0x20] sm:$0xff] }
   0x5   :  { %83 = vmatpush.msra.mxu0 %v80_v1  ;;  %241 = vmatpush.msra.mxu1 %v80_v1  ;;  %v69_v12 = vld [vmem:[%s454_s1 + $0x18] sm:$0xff]  ;;  %v68_v13 = vld [vmem:[%s454_s1 + $0x10] sm:$0xff]  ;;  %v67_v14 = vld [vmem:[%s454_s1 + $0x8] sm:$0xff] }
   0x6   :  { %245 = vmatpush.msra.mxu2 %v79_v2  ;;  %246 = vmatpush.msra.mxu3 %v79_v2  ;;  %v66_v15 = vld [vmem:[%s454_s1] sm:$0xff]  ;;  %v59_v20 = vld [vmem:[%s456_s0 + $0x48] sm:$0xff]  ;;  %v60_v24 = vld [vmem:[%s456_s0 + $0x50] sm:$0xff] }
   0x7   :  { %84 = vmatpush.msra.mxu0 %v79_v2  ;;  %244 = vmatpush.msra.mxu1 %v79_v2  ;;  %v58_v16 = vld [vmem:[%s456_s0 + $0x40] sm:$0xff]  ;;  %v63_v21 = vld [vmem:[%s456_s0 + $0x68] sm:$0xff]  ;;  %v64_v25 = vld [vmem:[%s456_s0 + $0x70] sm:$0xff] }
   0x8   :  { %248 = vmatpush.msra.mxu2 %v78_v3  ;;  %249 = vmatpush.msra.mxu3 %v78_v3  ;;  %v62_v17 = vld [vmem:[%s456_s0 + $0x60] sm:$0xff]  ;;  %v51_v22 = vld [vmem:[%s456_s0 + $0x8] sm:$0xff]  ;;  %v52_v26 = vld [vmem:[%s456_s0 + $0x10] sm:$0xff] }
   0x9   :  { %85 = vmatpush.msra.mxu0 %v78_v3  ;;  %247 = vmatpush.msra.mxu1 %v78_v3  ;;  %v50_v18 = vld [vmem:[%s456_s0] sm:$0xff]  ;;  %v55_v23 = vld [vmem:[%s456_s0 + $0x28] sm:$0xff]  ;;  %v56_v27 = vld [vmem:[%s456_s0 + $0x30] sm:$0xff] }
   0xa   :  { %251 = vmatpush.msra.mxu2 %v77_v4  ;;  %252 = vmatpush.msra.mxu3 %v77_v4  ;;  %v54_v19 = vld [vmem:[%s456_s0 + $0x20] sm:$0xff]  ;;  %v61_v28 = vld [vmem:[%s456_s0 + $0x58] sm:$0xff] }
   0xb   :  { %86 = vmatpush.msra.mxu0 %v77_v4  ;;  %250 = vmatpush.msra.mxu1 %v77_v4  ;;  %v65_v29 = vld [vmem:[%s456_s0 + $0x78] sm:$0xff]  ;;  %v286_v32 = vld [vmem:[%s455_s2] ss:$0 sm:$0xff] }
   0xc   :  { %254 = vmatpush.msra.mxu2 %v76_v5  ;;  %255 = vmatpush.msra.mxu3 %v76_v5  ;;  %v53_v30 = vld [vmem:[%s456_s0 + $0x18] sm:$0xff] }
   0xd   :  { %87 = vmatpush.msra.mxu0 %v76_v5  ;;  %253 = vmatpush.msra.mxu1 %v76_v5  ;;  %v57_v31 = vld [vmem:[%s456_s0 + $0x38] sm:$0xff] }
   0xe   :  { %257 = vmatpush.msra.mxu2 %v75_v6  ;;  %258 = vmatpush.msra.mxu3 %v75_v6 }
   0xf   :  { %88 = vmatpush.msra.mxu0 %v75_v6  ;;  %256 = vmatpush.msra.mxu1 %v75_v6 }
  0x10   :  { %260 = vmatpush.msra.mxu2 %v74_v7  ;;  %261 = vmatpush.msra.mxu3 %v74_v7 }
  0x11   :  { %89 = vmatpush.msra.mxu0 %v74_v7  ;;  %259 = vmatpush.msra.mxu1 %v74_v7 }
  0x12   :  { %263 = vmatpush.msra.mxu2 %v73_v8  ;;  %264 = vmatpush.msra.mxu3 %v73_v8 }
  0x13   :  { %90 = vmatpush.msra.mxu0 %v73_v8  ;;  %262 = vmatpush.msra.mxu1 %v73_v8 }
  0x14   :  { %266 = vmatpush.msra.mxu2 %v72_v9  ;;  %267 = vmatpush.msra.mxu3 %v72_v9 }
  0x15   :  { %91 = vmatpush.msra.mxu0 %v72_v9  ;;  %265 = vmatpush.msra.mxu1 %v72_v9 }
  0x16   :  { %269 = vmatpush.msra.mxu2 %v71_v10  ;;  %270 = vmatpush.msra.mxu3 %v71_v10 }
  0x17   :  { %92 = vmatpush.msra.mxu0 %v71_v10  ;;  %268 = vmatpush.msra.mxu1 %v71_v10 }
  0x18   :  { %272 = vmatpush.msra.mxu2 %v70_v11  ;;  %273 = vmatpush.msra.mxu3 %v70_v11 }
  0x19   :  { %93 = vmatpush.msra.mxu0 %v70_v11  ;;  %271 = vmatpush.msra.mxu1 %v70_v11 }
  0x1a   :  { %275 = vmatpush.msra.mxu2 %v69_v12  ;;  %276 = vmatpush.msra.mxu3 %v69_v12 }
  0x1b   :  { %94 = vmatpush.msra.mxu0 %v69_v12  ;;  %274 = vmatpush.msra.mxu1 %v69_v12 }
  0x1c   :  { %278 = vmatpush.msra.mxu2 %v68_v13  ;;  %279 = vmatpush.msra.mxu3 %v68_v13 }
  0x1d   :  { %95 = vmatpush.msra.mxu0 %v68_v13  ;;  %277 = vmatpush.msra.mxu1 %v68_v13 }
  0x1e   :  { %281 = vmatpush.msra.mxu2 %v67_v14  ;;  %282 = vmatpush.msra.mxu3 %v67_v14 }
  0x1f   :  { %96 = vmatpush.msra.mxu0 %v67_v14  ;;  %280 = vmatpush.msra.mxu1 %v67_v14 }
  0x20   :  { %284 = vmatpush.msra.mxu2 %v66_v15  ;;  %285 = vmatpush.msra.mxu3 %v66_v15 }
  0x21   :  { %122 = vmatmul.f32.vlgmr.msra.gmra.mxu2 %v58_v16  ;;  %134 = vmatmul.f32.vlgmr.msra.gmra.mxu3 %v62_v17 }
  0x22   :  { %97 = vmatpush.msra.mxu0 %v66_v15  ;;  %283 = vmatpush.msra.mxu1 %v66_v15 }
  0x23   :  { %98 = vmatmul.f32.vlgmr.msra.gmra.mxu0 %v50_v18  ;;  %110 = vmatmul.f32.vlgmr.msra.gmra.mxu1 %v54_v19 }
  0x29   :  { %125 = vmatmul.f32.gmra.mxu2 %v59_v20  ;;  %137 = vmatmul.f32.gmra.mxu3 %v63_v21 }
  0x2b   :  { %101 = vmatmul.f32.gmra.mxu0 %v51_v22  ;;  %113 = vmatmul.f32.gmra.mxu1 %v55_v23 }
  0x31   :  { %128 = vmatmul.f32.gmra.mxu2 %v60_v24  ;;  %140 = vmatmul.f32.gmra.mxu3 %v64_v25 }
  0x33   :  { %104 = vmatmul.f32.gmra.mxu0 %v52_v26  ;;  %116 = vmatmul.f32.gmra.mxu1 %v56_v27 }
  0x39   :  { %131 = vmatmul.f32.gmra.mxu2 %v61_v28  ;;  %143 = vmatmul.f32.gmra.mxu3 %v65_v29 }
  0x3b   :  { %107 = vmatmul.f32.gmra.mxu0 %v53_v30  ;;  %119 = vmatmul.f32.gmra.mxu1 %v57_v31 }
  0xa0   :  { %v99_v33 = vpop.f32.mrf.mxu0  ;;  %v111_v34 = vpop.f32.mrf.mxu1 }
  0xa1   :  { %v202_v35 = vadd.f32 %v286_v32, %v99_v33  ;;  %v206_v36 = vadd.f32 %v286_v32, %v111_v34 }
  0xa3   :  { %218 = vst [vmem:[%s457_s3] sm:$0xff] %v202_v35 }
  0xa4   :  { %222 = vst [vmem:[%s457_s3 + $0x20] sm:$0xff] %v206_v36  ;;  %v123_v37 = vpop.f32.mrf.mxu2  ;;  %v135_v38 = vpop.f32.mrf.mxu3 }
  0xa5   :  { %v210_v39 = vadd.f32 %v286_v32, %v123_v37  ;;  %v214_v40 = vadd.f32 %v286_v32, %v135_v38 }
  0xa7   :  { %226 = vst [vmem:[%s457_s3 + $0x40] sm:$0xff] %v210_v39 }
  0xa8   :  { %230 = vst [vmem:[%s457_s3 + $0x60] sm:$0xff] %v214_v40  ;;  %v102_v41 = vpop.f32.mrf.mxu0  ;;  %v114_v42 = vpop.f32.mrf.mxu1 }
  0xa9   :  { %v203_v43 = vadd.f32 %v286_v32, %v102_v41  ;;  %v207_v44 = vadd.f32 %v286_v32, %v114_v42 }
  0xab   :  { %219 = vst [vmem:[%s457_s3 + $0x8] sm:$0xff] %v203_v43 }
  0xac   :  { %223 = vst [vmem:[%s457_s3 + $0x28] sm:$0xff] %v207_v44  ;;  %v126_v45 = vpop.f32.mrf.mxu2  ;;  %v138_v46 = vpop.f32.mrf.mxu3 }
  0xad   :  { %v211_v47 = vadd.f32 %v286_v32, %v126_v45  ;;  %v215_v48 = vadd.f32 %v286_v32, %v138_v46 }
  0xaf   :  { %227 = vst [vmem:[%s457_s3 + $0x48] sm:$0xff] %v211_v47 }
  0xb0   :  { %231 = vst [vmem:[%s457_s3 + $0x68] sm:$0xff] %v215_v48  ;;  %v105_v49 = vpop.f32.mrf.mxu0  ;;  %v117_v50 = vpop.f32.mrf.mxu1 }
  0xb1   :  { %v204_v51 = vadd.f32 %v286_v32, %v105_v49  ;;  %v208_v52 = vadd.f32 %v286_v32, %v117_v50 }
  0xb3   :  { %220 = vst [vmem:[%s457_s3 + $0x10] sm:$0xff] %v204_v51 }
  0xb4   :  { %224 = vst [vmem:[%s457_s3 + $0x30] sm:$0xff] %v208_v52  ;;  %v129_v53 = vpop.f32.mrf.mxu2  ;;  %v141_v54 = vpop.f32.mrf.mxu3 }
  0xb5   :  { %v212_v55 = vadd.f32 %v286_v32, %v129_v53  ;;  %v216_v56 = vadd.f32 %v286_v32, %v141_v54 }
  0xb7   :  { %228 = vst [vmem:[%s457_s3 + $0x50] sm:$0xff] %v212_v55 }
  0xb8   :  { %232 = vst [vmem:[%s457_s3 + $0x70] sm:$0xff] %v216_v56  ;;  %v108_v57 = vpop.f32.mrf.mxu0  ;;  %v120_v58 = vpop.f32.mrf.mxu1 }
  0xb9   :  { %v205_v59 = vadd.f32 %v286_v32, %v108_v57  ;;  %v209_v60 = vadd.f32 %v286_v32, %v120_v58 }
  0xbb   :  { %221 = vst [vmem:[%s457_s3 + $0x18] sm:$0xff] %v205_v59 }
  0xbc   :  { %225 = vst [vmem:[%s457_s3 + $0x38] sm:$0xff] %v209_v60  ;;  %v132_v61 = vpop.f32.mrf.mxu2  ;;  %v144_v62 = vpop.f32.mrf.mxu3 }
  0xbd   :  { %v213_v63 = vadd.f32 %v286_v32, %v132_v61  ;;  %v217_v0 = vadd.f32 %v286_v32, %v144_v62 }
  0xbf   :  { %229 = vst [vmem:[%s457_s3 + $0x58] sm:$0xff] %v213_v63 }
  0xc0   :  { %233 = vst [vmem:[%s457_s3 + $0x78] sm:$0xff] %v217_v0 }

// kernel: downblock_forward.4
= control target key start
LH: loop header
LB: loop body
LE: loop exit
PB: predicated region body
PF: predicated region fallthrough
CT: control target
= control target key end

     0   :  { %s2032_s27 = smov 0   ;;  %s2034_s28 = smov 0   ;;  %s2785_s0 = inlined_call_operand.vmem [shape: f32[2,10,10,128], index: 0, kind: input, shape index: {}]   ;;  %s2786_s1 = inlined_call_operand.vmem [shape: f32[2,8,8,128], index: 1, kind: input, shape index: {}]   ;;  %s2787_s2 = inlined_call_operand.vmem [shape: f32[2,2,128], index: 2, kind: input, shape index: {}]   ;;  %s2788_s3 = inlined_call_operand.vmem [shape: f32[3,3,128], index: 3, kind: input, shape index: {}]   ;;  %s2789_s4 = inlined_call_operand.vmem [shape: f32[2,128], index: 4, kind: input, shape index: {}]   ;;  %s2790_s5 = inlined_call_operand.vmem [shape: f32[1,128], index: 5, kind: input, shape index: {}]   ;;  %s2791_s6 = inlined_call_operand.vmem [shape: bf16[128,128], index: 6, kind: input, shape index: {}]   ;;  %s2792_s7 = inlined_call_operand.vmem [shape: bf16[128,128], index: 7, kind: input, shape index: {}]   ;;  %s2793_s8 = inlined_call_operand.vmem [shape: f32[2,8,8,128], index: 8, kind: output, shape index: {}]  }
   0x1   :  { %s2036_s29 = smov 0  }
   0x2 LB: > { %s30_s30 = sadd.s32 1, %s1978_s28  ;;  %p1757_p0 = scmp.ge.s32.totalorder %s1982_s29, 1  ;;  %s1982_s29 = sphi %s2036_s29, %s18_s29   ;;  %s1978_s28 = sphi %s2034_s28, %s2795_s28   ;;  %s1974_s27 = sphi %s2032_s27, %s2794_s27  }
   0x3   : > { %p32_p1 = scmp.ge.s32.totalorder %s30_s30, 2  ;;  %p304_p2 = scmp.lt.s32.totalorder %s1982_s29, 3 }
   0x5   : > { %s2797_s30 = smov (%p32_p1, %s30_s30), 0  ;;  %p305_p3 = pnand %p1757_p0, %p304_p2 }
   0x6   : > { %p355_p4 = scmp.lt.s32.totalorder (!%p305_p3), %s1974_s27, 1 }
   0x7   : > { %308 = sbr.rel (%p305_p3) target bundleno = 595 (0x253), region = 52 }
   0xc   : > { %s2799_s27 = smov (!%p355_p4, %s1974_s27), 1  ;;  %v2055_v0 = vld [vmem:[%s2788_s3] ss:$0 sm:$0xff]  ;;  %v2060_v1 = vld [vmem:[%s2788_s3 + $0x4] ss:$0 sm:$0xff]  ;;  %vm483_vm0 = vcmask 1046528  }
   0xd   : > { %v2065_v2 = vld [vmem:[%s2788_s3 + $0x8] ss:$0 sm:$0xff]  ;;  %v2070_v3 = vld [vmem:[%s2788_s3 + $0x1] ss:$0 sm:$0xff]  ;;  %s1870_s17 = smul.u32 160, %s2799_s27  ;;  %vm706_vm1 = vcmask 1045504  }
   0xe   : > { %v2076_v4 = vld [vmem:[%s2788_s3 + $0x5] ss:$0 sm:$0xff]  ;;  %v2081_v5 = vld [vmem:[%s2788_s3 + $0x9] ss:$0 sm:$0xff]  ;;  %v2091_v6 = vld [vmem:[%s2788_s3 + $0x2] ss:$0 sm:$0xff] }
   0xf   : > { %s2086_s24 = scalar_lea.vmem %s2785_s0, %s1870_s17  ;;  %v2130_v21 = vld [vmem:[%s2788_s3 + $0x6] ss:$0 sm:$0xff]  ;;  %v2137_v26 = vld [vmem:[%s2788_s3 + $0xa] ss:$0 sm:$0xff]  ;;  %s1761_s15 = sshll.u32 %s2799_s27, 1 }
  0x10   : > { %v2094_v7 = vld [vmem:[%s2086_s24 + $0x40] sm:$0xff]  ;;  %v2097_v8 = vld [vmem:[%s2086_s24 + $0x48] sm:$0x3]  ;;  %v2100_v9 = vld [vmem:[%s2086_s24 + $0x50] sm:$0xff]  ;;  %s2425_s18 = scalar_lea.vmem %s2787_s2, %s1761_s15  ;;  %s1836_s19 = sshll.u32 %s2799_s27, 6 }
  0x11   : > { %v2103_v10 = vld [vmem:[%s2086_s24 + $0x58] sm:$0x3]  ;;  %v2106_v11 = vld [vmem:[%s2086_s24 + $0x60] sm:$0xff]  ;;  %v2109_v12 = vld [vmem:[%s2086_s24 + $0x68] sm:$0x3]  ;;  %v407_v13 = vmul.f32 %v2055_v0, %v2094_v7  ;;  %v418_v14 = vmul.f32 %v2060_v1, %v2100_v9  ;;  %v459_v15 = vmul.f32 %v2070_v3, %v2094_v7  ;;  %v460_v16 = vmul.f32 %v2070_v3, %v2097_v8  ;;  %s2749_s22 = scalar_lea.vmem %s2786_s1, %s1836_s19  ;;  %s380_s25 = scalar_lea.vmem %s2793_s8, %s1836_s19 }
  0x12   : > { %v437_v17 = vmul.f32 %v2065_v2, %v2106_v11  ;;  %v534_v18 = vmul.f32 %v2076_v4, %v2100_v9  ;;  %v535_v19 = vmul.f32 %v2076_v4, %v2103_v10  ;;  %v608_v20 = vmul.f32 %v2081_v5, %v2106_v11  ;;  %v381_v35 = vld [vmem:[%s2086_s24] sm:$0xff]  ;;  %v2151_v40 = vld [vmem:[%s2086_s24 + $0x10] sm:$0xff]  ;;  %v382_v49 = vld [vmem:[%s2086_s24 + $0x8] sm:$0x3] }
  0x13   : > { %v426_v22 = vadd.f32 %v418_v14, %v407_v13  ;;  %v496_v23 = vrot.slane %v459_v15, 1  ;;  %v497_v24 = vrot.slane %v460_v16, 1  ;;  %v609_v25 = vmul.f32 %v2081_v5, %v2109_v12  ;;  %v2157_v45 = vld [vmem:[%s2086_s24 + $0x20] sm:$0xff]  ;;  %v2165_v54 = vld [vmem:[%s2086_s24 + $0x18] sm:$0x3] }
  0x14   : > { %v570_v27 = vrot.slane %v534_v18, 1  ;;  %v571_v28 = vrot.slane %v535_v19, 1  ;;  %v644_v29 = vrot.slane %v608_v20, 1  ;;  %v682_v30 = vmul.f32 %v2091_v6, %v2094_v7  ;;  %v2174_v61 = vld [vmem:[%s2086_s24 + $0x28] sm:$0x3] }
  0x15   : > { %v445_v31 = vadd.f32 %v437_v17, %v426_v22  ;;  %v498_v32 = vsel %vm483_vm0, %v496_v23, %v497_v24  ;;  %v645_v33 = vrot.slane %v609_v25, 1  ;;  %v683_v34 = vmul.f32 %v2091_v6, %v2097_v8 }
  0x16   : > { %v572_v36 = vsel %vm483_vm0, %v570_v27, %v571_v28  ;;  %v719_v37 = vrot.slane %v682_v30, 2  ;;  %v757_v38 = vmul.f32 %v2130_v21, %v2100_v9  ;;  %v758_v39 = vmul.f32 %v2130_v21, %v2103_v10 }
  0x17   : > { %v520_v41 = vadd.f32 %v498_v32, %v445_v31  ;;  %v646_v42 = vsel %vm483_vm0, %v644_v29, %v645_v33  ;;  %v720_v43 = vrot.slane %v683_v34, 2  ;;  %v831_v44 = vmul.f32 %v2137_v26, %v2106_v11  ;;  %v2190_v29 = vld [vmem:[%s2789_s4] ss:$0 sm:$0xff] }
  0x18   : > { %v793_v46 = vrot.slane %v757_v38, 2  ;;  %v794_v47 = vrot.slane %v758_v39, 2  ;;  %v832_v48 = vmul.f32 %v2137_v26, %v2109_v12  ;;  %v403_v50 = vmul.f32 %v2055_v0, %v381_v35 }
  0x19   : > { %v594_v51 = vadd.f32 %v572_v36, %v520_v41  ;;  %v721_v52 = vsel %vm706_vm1, %v719_v37, %v720_v43  ;;  %v867_v53 = vrot.slane %v831_v44, 2  ;;  %v414_v55 = vmul.f32 %v2060_v1, %v2151_v40 }
  0x1a   : > { %v795_v56 = vsel %vm706_vm1, %v793_v46, %v794_v47  ;;  %v868_v57 = vrot.slane %v832_v48, 2  ;;  %v433_v58 = vmul.f32 %v2065_v2, %v2157_v45  ;;  %v451_v59 = vmul.f32 %v2070_v3, %v381_v35  ;;  %v2205_v47 = vld [vmem:[%s2086_s24 + $0x70] sm:$0xff] }
  0x1b   : > { %v668_v60 = vadd.f32 %v646_v42, %v594_v51  ;;  %v422_v62 = vadd.f32 %v414_v55, %v403_v50  ;;  %v452_v63 = vmul.f32 %v2070_v3, %v382_v49  ;;  %v526_v13 = vmul.f32 %v2076_v4, %v2151_v40 }
  0x1c   : > { %v869_v14 = vsel %vm706_vm1, %v867_v53, %v868_v57  ;;  %v484_v15 = vrot.slane %v451_v59, 1  ;;  %v527_v16 = vmul.f32 %v2076_v4, %v2165_v54  ;;  %v600_v17 = vmul.f32 %v2081_v5, %v2157_v45  ;;  %v2220_v59 = vld [vmem:[%s2086_s24 + $0x78] sm:$0x3] }
  0x1d   : > { %v743_v18 = vadd.f32 %v721_v52, %v668_v60  ;;  %v441_v19 = vadd.f32 %v433_v58, %v422_v62  ;;  %v485_v20 = vrot.slane %v452_v63, 1  ;;  %v558_v22 = vrot.slane %v526_v13, 1 }
  0x1e   : > { %v559_v23 = vrot.slane %v527_v16, 1  ;;  %v601_v24 = vmul.f32 %v2081_v5, %v2174_v61  ;;  %v632_v25 = vrot.slane %v600_v17, 1  ;;  %v674_v27 = vmul.f32 %v2091_v6, %v381_v35 }
  0x1f   : > { %v817_v28 = vadd.f32 %v795_v56, %v743_v18  ;;  %v486_v30 = vsel %vm483_vm0, %v484_v15, %v485_v20  ;;  %v675_v31 = vmul.f32 %v2091_v6, %v382_v49  ;;  %v749_v32 = vmul.f32 %v2130_v21, %v2151_v40 }
  0x20   : > { %v516_v33 = vadd.f32 %v486_v30, %v441_v19  ;;  %v560_v34 = vsel %vm483_vm0, %v558_v22, %v559_v23  ;;  %v633_v36 = vrot.slane %v601_v24, 1  ;;  %v707_v37 = vrot.slane %v674_v27, 2 }
  0x21   : > { %v891_v35 = vadd.f32 %v869_v14, %v817_v28  ;;  %v708_v38 = vrot.slane %v675_v31, 2  ;;  %v750_v39 = vmul.f32 %v2130_v21, %v2165_v54  ;;  %v781_v41 = vrot.slane %v749_v32, 2 }
  0x22   : > { %v590_v42 = vadd.f32 %v560_v34, %v516_v33  ;;  %v634_v43 = vsel %vm483_vm0, %v632_v25, %v633_v36  ;;  %v823_v44 = vmul.f32 %v2137_v26, %v2157_v45  ;;  %v824_v46 = vmul.f32 %v2137_v26, %v2174_v61 }
  0x23   : > { %v2208_v48 = vadd.f32 %v2190_v29, %v891_v35  ;;  %v709_v49 = vsel %vm706_vm1, %v707_v37, %v708_v38  ;;  %v782_v50 = vrot.slane %v750_v39, 2  ;;  %v408_v51 = vmul.f32 %v2055_v0, %v2100_v9 }
  0x24   : > { %v664_v52 = vadd.f32 %v634_v43, %v590_v42  ;;  %v855_v53 = vrot.slane %v823_v44, 2  ;;  %v856_v55 = vrot.slane %v824_v46, 2  ;;  %v419_v56 = vmul.f32 %v2060_v1, %v2106_v11  ;;  %v2252_v44 = vld [vmem:[%s2086_s24 + $0x30] sm:$0xff] }
  0x25   : > { %913 = vadd.xlane.f32.xlu0 %v2208_v48  ;;  %v783_v57 = vsel %vm706_vm1, %v781_v41, %v782_v50  ;;  %v933_v58 = vmul.f32 %v2208_v48, %v2208_v48  ;;  %v438_v60 = vmul.f32 %v2065_v2, %v2205_v47  ;;  %v461_v62 = vmul.f32 %v2070_v3, %v2100_v9 }
  0x26   : > { %v739_v63 = vadd.f32 %v709_v49, %v664_v52  ;;  %v857_v13 = vsel %vm706_vm1, %v855_v53, %v856_v55  ;;  %v427_v14 = vadd.f32 %v419_v56, %v408_v51  ;;  %v462_v15 = vmul.f32 %v2070_v3, %v2103_v10 }
  0x27   : > { %945 = vadd.xlane.f32.xlu1 %v933_v58  ;;  %v499_v16 = vrot.slane %v461_v62, 1  ;;  %v536_v17 = vmul.f32 %v2076_v4, %v2106_v11  ;;  %v537_v18 = vmul.f32 %v2076_v4, %v2109_v12  ;;  %v610_v19 = vmul.f32 %v2081_v5, %v2205_v47 }
  0x28   : > { %v813_v20 = vadd.f32 %v783_v57, %v739_v63  ;;  %v446_v22 = vadd.f32 %v438_v60, %v427_v14  ;;  %v500_v23 = vrot.slane %v462_v15, 1  ;;  %v611_v24 = vmul.f32 %v2081_v5, %v2220_v59 }
  0x29   : > { %v573_v25 = vrot.slane %v536_v17, 1  ;;  %v574_v27 = vrot.slane %v537_v18, 1  ;;  %v647_v28 = vrot.slane %v610_v19, 1  ;;  %v684_v30 = vmul.f32 %v2091_v6, %v2100_v9 }
  0x2a   : > { %v887_v31 = vadd.f32 %v857_v13, %v813_v20  ;;  %v501_v32 = vsel %vm483_vm0, %v499_v16, %v500_v23  ;;  %v648_v33 = vrot.slane %v611_v24, 1  ;;  %v685_v34 = vmul.f32 %v2091_v6, %v2103_v10  ;;  %v2268_v13 = vld [vmem:[%s2086_s24 + $0x38] sm:$0x3] }
  0x2b   : > { %v521_v36 = vadd.f32 %v501_v32, %v446_v22  ;;  %v575_v37 = vsel %vm483_vm0, %v573_v25, %v574_v27  ;;  %v722_v35 = vrot.slane %v684_v30, 2  ;;  %v759_v38 = vmul.f32 %v2130_v21, %v2106_v11 }
  0x2c   : > { %v2246_v39 = vadd.f32 %v2190_v29, %v887_v31  ;;  %v649_v41 = vsel %vm483_vm0, %v647_v28, %v648_v33  ;;  %v723_v42 = vrot.slane %v685_v34, 2  ;;  %v760_v43 = vmul.f32 %v2130_v21, %v2109_v12 }
  0x2d   : > { %v595_v46 = vadd.f32 %v575_v37, %v521_v36  ;;  %v796_v49 = vrot.slane %v759_v38, 2  ;;  %v833_v50 = vmul.f32 %v2137_v26, %v2205_v47  ;;  %v834_v51 = vmul.f32 %v2137_v26, %v2220_v59 }
  0x2e   : > { %905 = vadd.xlane.f32.xlu2 %v2246_v39  ;;  %v724_v52 = vsel %vm706_vm1, %v722_v35, %v723_v42  ;;  %v797_v53 = vrot.slane %v760_v43, 2  ;;  %v404_v55 = vmul.f32 %v2055_v0, %v2151_v40  ;;  %v415_v56 = vmul.f32 %v2060_v1, %v2157_v45 }
  0x2f   : > { %v669_v57 = vadd.f32 %v649_v41, %v595_v46  ;;  %v870_v58 = vrot.slane %v833_v50, 2  ;;  %v871_v60 = vrot.slane %v834_v51, 2  ;;  %v434_v62 = vmul.f32 %v2065_v2, %v2252_v44 }
  0x30   : > { %v798_v63 = vsel %vm706_vm1, %v796_v49, %v797_v53  ;;  %v423_v14 = vadd.f32 %v415_v56, %v404_v55  ;;  %v453_v15 = vmul.f32 %v2070_v3, %v2151_v40  ;;  %v454_v16 = vmul.f32 %v2070_v3, %v2165_v54  ;;  %v399_v53 = vld [vmem:[%s2086_s24 + $0x90] sm:$0xff] }
  0x31   : > { %v744_v17 = vadd.f32 %v724_v52, %v669_v57  ;;  %v872_v18 = vsel %vm706_vm1, %v870_v58, %v871_v60  ;;  %v528_v19 = vmul.f32 %v2076_v4, %v2157_v45  ;;  %v529_v20 = vmul.f32 %v2076_v4, %v2174_v61  ;;  %v2300_v52 = vld [vmem:[%s2086_s24 + $0x80] sm:$0xff] }
  0x32   : > { %v442_v22 = vadd.f32 %v434_v62, %v423_v14  ;;  %v487_v23 = vrot.slane %v453_v15, 1  ;;  %v488_v24 = vrot.slane %v454_v16, 1  ;;  %v602_v25 = vmul.f32 %v2081_v5, %v2252_v44  ;;  %v2310_v14 = vld [vmem:[%s2086_s24 + $0x88] sm:$0x3] }
  0x33   : > { %v818_v27 = vadd.f32 %v798_v63, %v744_v17  ;;  %v561_v28 = vrot.slane %v528_v19, 1  ;;  %v562_v30 = vrot.slane %v529_v20, 1  ;;  %v603_v31 = vmul.f32 %v2081_v5, %v2268_v13 }
  0x34   : > { %v489_v32 = vsel %vm483_vm0, %v487_v23, %v488_v24  ;;  %v635_v33 = vrot.slane %v602_v25, 1  ;;  %v676_v34 = vmul.f32 %v2091_v6, %v2151_v40  ;;  %v677_v36 = vmul.f32 %v2091_v6, %v2165_v54 }
  0x35   : > { %v892_v37 = vadd.f32 %v872_v18, %v818_v27  ;;  %v517_v35 = vadd.f32 %v489_v32, %v442_v22  ;;  %v563_v38 = vsel %vm483_vm0, %v561_v28, %v562_v30  ;;  %v636_v41 = vrot.slane %v603_v31, 1  ;;  %v400_v22 = vld [vmem:[%s2086_s24 + $0x98] sm:$0x3] }
  0x36   : > { %v710_v42 = vrot.slane %v676_v34, 2  ;;  %v711_v43 = vrot.slane %v677_v36, 2  ;;  %v751_v46 = vmul.f32 %v2130_v21, %v2157_v45  ;;  %v752_v49 = vmul.f32 %v2130_v21, %v2174_v61 }
  0x37   : > { %v2294_v50 = vadd.f32 %v2190_v29, %v892_v37  ;;  %v591_v40 = vadd.f32 %v563_v38, %v517_v35  ;;  %v637_v54 = vsel %vm483_vm0, %v635_v33, %v636_v41  ;;  %v825_v51 = vmul.f32 %v2137_v26, %v2252_v44 }
  0x38   : > { %v712_v55 = vsel %vm706_vm1, %v710_v42, %v711_v43  ;;  %v784_v56 = vrot.slane %v751_v46, 2  ;;  %v785_v57 = vrot.slane %v752_v49, 2  ;;  %v826_v58 = vmul.f32 %v2137_v26, %v2268_v13 }
  0x39   : > { %915 = vadd.xlane.f32.xlu0 %v2294_v50  ;;  %v665_v60 = vadd.f32 %v637_v54, %v591_v40  ;;  %v858_v62 = vrot.slane %v825_v51, 2  ;;  %v934_v63 = vmul.f32 %v2294_v50, %v2294_v50  ;;  %v410_v15 = vmul.f32 %v2055_v0, %v2205_v47 }
  0x3a   : > { %v786_v16 = vsel %vm706_vm1, %v784_v56, %v785_v57  ;;  %v859_v17 = vrot.slane %v826_v58, 2  ;;  %v421_v18 = vmul.f32 %v2060_v1, %v2300_v52  ;;  %v440_v19 = vmul.f32 %v2065_v2, %v399_v53 }
  0x3b   : > { %v740_v20 = vadd.f32 %v712_v55, %v665_v60  ;;  %947 = vadd.xlane.f32.xlu1 %v934_v63  ;;  %v465_v23 = vmul.f32 %v2070_v3, %v2205_v47  ;;  %v466_v24 = vmul.f32 %v2070_v3, %v2220_v59  ;;  %v540_v25 = vmul.f32 %v2076_v4, %v2300_v52 }
  0x3c   : > { %v860_v27 = vsel %vm706_vm1, %v858_v62, %v859_v17  ;;  %v429_v28 = vadd.f32 %v421_v18, %v410_v15  ;;  %v541_v30 = vmul.f32 %v2076_v4, %v2310_v14  ;;  %v614_v31 = vmul.f32 %v2081_v5, %v399_v53 }
  0x3d   : > { %v814_v32 = vadd.f32 %v786_v16, %v740_v20  ;;  %v505_v33 = vrot.slane %v465_v23, 1  ;;  %v506_v34 = vrot.slane %v466_v24, 1  ;;  %v579_v36 = vrot.slane %v540_v25, 1 }
  0x3e   : > { %v448_v37 = vadd.f32 %v440_v19, %v429_v28  ;;  %v580_v35 = vrot.slane %v541_v30, 1  ;;  %v615_v38 = vmul.f32 %v2081_v5, %v400_v22  ;;  %v653_v41 = vrot.slane %v614_v31, 1 }
  0x3f   : > { %v888_v42 = vadd.f32 %v860_v27, %v814_v32  ;;  %v507_v43 = vsel %vm483_vm0, %v505_v33, %v506_v34  ;;  %v688_v46 = vmul.f32 %v2091_v6, %v2205_v47  ;;  %v689_v49 = vmul.f32 %v2091_v6, %v2220_v59 }
  0x40   : > { %v523_v40 = vadd.f32 %v507_v43, %v448_v37  ;;  %v581_v54 = vsel %vm483_vm0, %v579_v36, %v580_v35  ;;  %v654_v51 = vrot.slane %v615_v38, 1  ;;  %v763_v55 = vmul.f32 %v2130_v21, %v2300_v52 }
  0x41   : > { %v2339_v56 = vadd.f32 %v2190_v29, %v888_v42  ;;  %v728_v57 = vrot.slane %v688_v46, 2  ;;  %v729_v58 = vrot.slane %v689_v49, 2  ;;  %v764_v60 = vmul.f32 %v2130_v21, %v2310_v14 }
  0x42   : > { %v597_v62 = vadd.f32 %v581_v54, %v523_v40  ;;  %v655_v63 = vsel %vm483_vm0, %v653_v41, %v654_v51  ;;  %v802_v15 = vrot.slane %v763_v55, 2  ;;  %v837_v16 = vmul.f32 %v2137_v26, %v399_v53 }
  0x43   : > { %907 = vadd.xlane.f32.xlu2 %v2339_v56  ;;  %v730_v17 = vsel %vm706_vm1, %v728_v57, %v729_v58  ;;  %v803_v18 = vrot.slane %v764_v60, 2  ;;  %v838_v19 = vmul.f32 %v2137_v26, %v400_v22  ;;  %v409_v20 = vmul.f32 %v2055_v0, %v2106_v11 }
  0x44   : > { %v671_v23 = vadd.f32 %v655_v63, %v597_v62  ;;  %v876_v24 = vrot.slane %v837_v16, 2  ;;  %v420_v25 = vmul.f32 %v2060_v1, %v2205_v47  ;;  %v439_v27 = vmul.f32 %v2065_v2, %v2300_v52 }
  0x45   : > { %v804_v53 = vsel %vm706_vm1, %v802_v15, %v803_v18  ;;  %v877_v28 = vrot.slane %v838_v19, 2  ;;  %v463_v30 = vmul.f32 %v2070_v3, %v2106_v11  ;;  %v464_v22 = vmul.f32 %v2070_v3, %v2109_v12 }
  0x46   : > { %v746_v31 = vadd.f32 %v730_v17, %v671_v23  ;;  %v428_v32 = vadd.f32 %v420_v25, %v409_v20  ;;  %v538_v33 = vmul.f32 %v2076_v4, %v2205_v47  ;;  %v539_v34 = vmul.f32 %v2076_v4, %v2220_v59 }
  0x47   : > { %v878_v36 = vsel %vm706_vm1, %v876_v24, %v877_v28  ;;  %v502_v37 = vrot.slane %v463_v30, 1  ;;  %v503_v35 = vrot.slane %v464_v22, 1  ;;  %v612_v38 = vmul.f32 %v2081_v5, %v2300_v52 }
  0x48   : > { %v820_v41 = vadd.f32 %v804_v53, %v746_v31  ;;  %v447_v42 = vadd.f32 %v439_v27, %v428_v32  ;;  %v576_v43 = vrot.slane %v538_v33, 1  ;;  %v577_v46 = vrot.slane %v539_v34, 1 }
  0x49   : > { %v504_v49 = vsel %vm483_vm0, %v502_v37, %v503_v35  ;;  %v613_v40 = vmul.f32 %v2081_v5, %v2310_v14  ;;  %v650_v54 = vrot.slane %v612_v38, 1  ;;  %v686_v51 = vmul.f32 %v2091_v6, %v2106_v11 }
  0x4a   : > { %v894_v55 = vadd.f32 %v878_v36, %v820_v41  ;;  %v522_v57 = vadd.f32 %v504_v49, %v447_v42  ;;  %v578_v58 = vsel %vm483_vm0, %v576_v43, %v577_v46  ;;  %v687_v60 = vmul.f32 %v2091_v6, %v2109_v12 }
  0x4b   : > { %v651_v62 = vrot.slane %v613_v40, 1  ;;  %v725_v63 = vrot.slane %v686_v51, 2  ;;  %v761_v15 = vmul.f32 %v2130_v21, %v2205_v47  ;;  %v762_v16 = vmul.f32 %v2130_v21, %v2220_v59 }
  0x4c   : > { %v2379_v17 = vadd.f32 %v2190_v29, %v894_v55  ;;  %v596_v18 = vadd.f32 %v578_v58, %v522_v57  ;;  %v726_v11 = vrot.slane %v687_v60, 2  ;;  %v835_v19 = vmul.f32 %v2137_v26, %v2300_v52 }
  0x4d   : > { %v652_v20 = vsel %vm483_vm0, %v650_v54, %v651_v62  ;;  %v799_v23 = vrot.slane %v761_v15, 2  ;;  %v800_v12 = vrot.slane %v762_v16, 2  ;;  %v836_v24 = vmul.f32 %v2137_v26, %v2310_v14 }
  0x4e   : > { %919 = vadd.xlane.f32.xlu0 %v2379_v17  ;;  %v670_v47 = vadd.f32 %v652_v20, %v596_v18  ;;  %v727_v59 = vsel %vm706_vm1, %v725_v63, %v726_v11  ;;  %v873_v25 = vrot.slane %v835_v19, 2  ;;  %v930_v27 = vmul.f32 %v2339_v56, %v2339_v56 }
  0x4f   : > { %v801_v53 = vsel %vm706_vm1, %v799_v23, %v800_v12  ;;  %v874_v28 = vrot.slane %v836_v24, 2  ;;  %v2393_v52 = vmul.f32 %v2379_v17, %v2379_v17  ;;  %v929_v30 = vmul.f32 %v2246_v39, %v2246_v39 }
  0x50   : > { %v745_v14 = vadd.f32 %v727_v59, %v670_v47  ;;  %939 = vadd.xlane.f32.xlu1 %v930_v27  ;;  %v405_v22 = vmul.f32 %v2055_v0, %v2157_v45  ;;  %v416_v31 = vmul.f32 %v2060_v1, %v2252_v44  ;;  %v435_v32 = vmul.f32 %v2065_v2, %v2094_v7 }
  0x51   : > { %v875_v33 = vsel %vm706_vm1, %v873_v25, %v874_v28  ;;  %v455_v34 = vmul.f32 %v2070_v3, %v2157_v45  ;;  %v456_v36 = vmul.f32 %v2070_v3, %v2174_v61  ;;  %v530_v37 = vmul.f32 %v2076_v4, %v2252_v44 }
  0x52   : > { %v819_v35 = vadd.f32 %v801_v53, %v745_v14  ;;  %v424_v38 = vadd.f32 %v416_v31, %v405_v22  ;;  %v531_v41 = vmul.f32 %v2076_v4, %v2268_v13  ;;  %v604_v42 = vmul.f32 %v2081_v5, %v2094_v7 }
  0x53   : > { %v490_v43 = vrot.slane %v455_v34, 1  ;;  %v491_v46 = vrot.slane %v456_v36, 1  ;;  %v564_v49 = vrot.slane %v530_v37, 1  ;;  %v605_v40 = vmul.f32 %v2081_v5, %v2097_v8 }
  0x54   : > { %v893_v54 = vadd.f32 %v875_v33, %v819_v35  ;;  %v443_v51 = vadd.f32 %v435_v32, %v424_v38  ;;  %v565_v55 = vrot.slane %v531_v41, 1  ;;  %v638_v57 = vrot.slane %v604_v42, 1 }
  0x55   : > { %v492_v58 = vsel %vm483_vm0, %v490_v43, %v491_v46  ;;  %v639_v60 = vrot.slane %v605_v40, 1  ;;  %v678_v62 = vmul.f32 %v2091_v6, %v2157_v45  ;;  %v679_v63 = vmul.f32 %v2091_v6, %v2174_v61 }
  0x56   : > { %v2428_v15 = vadd.f32 %v2190_v29, %v893_v54  ;;  %937 = vadd.xlane.f32.xlu0 %v929_v30  ;;  %v518_v16 = vadd.f32 %v492_v58, %v443_v51  ;;  %v566_v18 = vsel %vm483_vm0, %v564_v49, %v565_v55  ;;  %v753_v11 = vmul.f32 %v2130_v21, %v2252_v44 }
  0x57   : > { %v640_v45 = vsel %vm483_vm0, %v638_v57, %v639_v60  ;;  %v713_v19 = vrot.slane %v678_v62, 2  ;;  %v714_v20 = vrot.slane %v679_v63, 2  ;;  %v754_v61 = vmul.f32 %v2130_v21, %v2268_v13 }
  0x58   : > { %917 = vadd.xlane.f32.xlu2 %v2428_v15  ;;  %v935_v23 = vmul.f32 %v2428_v15, %v2428_v15  ;;  %v592_v12 = vadd.f32 %v566_v18, %v518_v16  ;;  %v787_v24 = vrot.slane %v753_v11, 2  ;;  %v827_v47 = vmul.f32 %v2137_v26, %v2094_v7 }
  0x59   : > { %v715_v59 = vsel %vm706_vm1, %v713_v19, %v714_v20  ;;  %v788_v25 = vrot.slane %v754_v61, 2  ;;  %v828_v27 = vmul.f32 %v2137_v26, %v2097_v8  ;;  %v406_v53 = vmul.f32 %v2055_v0, %v2252_v44 }
  0x5a   : > { %949 = vadd.xlane.f32.xlu1 %v935_v23  ;;  %v666_v28 = vadd.f32 %v640_v45, %v592_v12  ;;  %v861_v30 = vrot.slane %v827_v47, 2  ;;  %v417_v14 = vmul.f32 %v2060_v1, %v2094_v7  ;;  %v436_v22 = vmul.f32 %v2065_v2, %v2100_v9 }
  0x5b   : > { %v789_v31 = vsel %vm706_vm1, %v787_v24, %v788_v25  ;;  %v862_v32 = vrot.slane %v828_v27, 2  ;;  %v457_v33 = vmul.f32 %v2070_v3, %v2252_v44  ;;  %v458_v34 = vmul.f32 %v2070_v3, %v2268_v13 }
  0x5c   : > { %v741_v36 = vadd.f32 %v715_v59, %v666_v28  ;;  %v425_v0 = vadd.f32 %v417_v14, %v406_v53  ;;  %v532_v37 = vmul.f32 %v2076_v4, %v2094_v7  ;;  %v533_v1 = vmul.f32 %v2076_v4, %v2097_v8  ;;  %v1845_v14 = vld [vmem:[%s2791_s6 + $0x38] sm:$0xff] }
  0x5d   : > { %v863_v35 = vsel %vm706_vm1, %v861_v30, %v862_v32  ;;  %v493_v2 = vrot.slane %v457_v33, 1  ;;  %v494_v38 = vrot.slane %v458_v34, 1  ;;  %v606_v41 = vmul.f32 %v2081_v5, %v2100_v9  ;;  %1854 = vmatpush.bf16.msra.mxu2 %v1845_v14  ;;  %1173 = vmatpush.bf16.msra.mxu0 %v1845_v14  ;;  %v1843_v34 = vld [vmem:[%s2791_s6 + $0x28] sm:$0xff] }
  0x5e   : > { %v815_v42 = vadd.f32 %v789_v31, %v741_v36  ;;  %v444_v43 = vadd.f32 %v436_v22, %v425_v0  ;;  %v567_v46 = vrot.slane %v532_v37, 1  ;;  %v568_v49 = vrot.slane %v533_v1, 1 }
  0x5f   : > { %v495_v3 = vsel %vm483_vm0, %v493_v2, %v494_v38  ;;  %v607_v40 = vmul.f32 %v2081_v5, %v2103_v10  ;;  %v641_v54 = vrot.slane %v606_v41, 1  ;;  %v680_v4 = vmul.f32 %v2091_v6, %v2252_v44  ;;  %v1842_v2 = vld [vmem:[%s2791_s6 + $0x20] sm:$0xff] }
  0x60   : > { %951 = vadd.xlane.f32.xlu2 %v2393_v52  ;;  %v889_v51 = vadd.f32 %v863_v35, %v815_v42  ;;  %v519_v55 = vadd.f32 %v495_v3, %v444_v43  ;;  %v569_v57 = vsel %vm483_vm0, %v567_v46, %v568_v49  ;;  %v681_v58 = vmul.f32 %v2091_v6, %v2268_v13  ;;  %v1841_v43 = vld [vmem:[%s2791_s6 + $0x18] sm:$0xff]  ;;  %v1840_v49 = vld [vmem:[%s2791_s6 + $0x10] sm:$0xff] }
  0x61   : > { %v642_v60 = vrot.slane %v607_v40, 1  ;;  %v716_v62 = vrot.slane %v680_v4, 2  ;;  %v755_v63 = vmul.f32 %v2130_v21, %v2094_v7  ;;  %v756_v5 = vmul.f32 %v2130_v21, %v2097_v8  ;;  %v1839_v4 = vld [vmem:[%s2791_s6 + $0x8] sm:$0xff] }
  0x62   : > { %v2476_v16 = vadd.f32 %v2190_v29, %v889_v51  ;;  %v593_v44 = vadd.f32 %v569_v57, %v519_v55  ;;  %v717_v52 = vrot.slane %v681_v58, 2  ;;  %v829_v18 = vmul.f32 %v2137_v26, %v2100_v9 }
  0x63   : > { %v643_v11 = vsel %vm483_vm0, %v641_v54, %v642_v60  ;;  %v790_v45 = vrot.slane %v755_v63, 2  ;;  %v791_v6 = vrot.slane %v756_v5, 2  ;;  %v830_v13 = vmul.f32 %v2137_v26, %v2103_v10  ;;  %v1838_v5 = vld [vmem:[%s2791_s6] sm:$0xff] }
  0x64   : > { %909 = vadd.xlane.f32.xlu0 %v2476_v16  ;;  %v931_v7 = vmul.f32 %v2476_v16, %v2476_v16  ;;  %v667_v8 = vadd.f32 %v643_v11, %v593_v44  ;;  %v718_v21 = vsel %vm706_vm1, %v716_v62, %v717_v52  ;;  %v864_v19 = vrot.slane %v829_v18, 2  ;;  %v2523_v11 = vld [vmem:[%s2425_s18] ss:$0 sm:$0xff] }
  0x65   : > { %v792_v20 = vsel %vm706_vm1, %v790_v45, %v791_v6  ;;  %v865_v61 = vrot.slane %v830_v13, 2 }
  0x66   : > { %v742_v9 = vadd.f32 %v718_v21, %v667_v8 }
  0x67   : > { %v866_v23 = vsel %vm706_vm1, %v864_v19, %v865_v61  ;;  %v2532_v61 = vld [vmem:[%s2425_s18 + $0x1] ss:$0 sm:$0xff] }
  0x68   : > { %941 = vadd.xlane.f32.xlu2 %v931_v7  ;;  %v816_v12 = vadd.f32 %v792_v20, %v742_v9 }
  0x6a   : > { %v890_v24 = vadd.f32 %v866_v23, %v816_v12 }
  0x6c   : > { %v2490_v10 = vadd.f32 %v2190_v29, %v890_v24  ;;  %v1844_v29 = vld [vmem:[%s2791_s6 + $0x30] sm:$0xff] }
  0x6d   : > { %1855 = vmatpush.bf16.msra.mxu2 %v1844_v29  ;;  %1174 = vmatpush.bf16.msra.mxu0 %v1844_v29 }
  0x6e   : > { %911 = vadd.xlane.f32.xlu1 %v2490_v10  ;;  %v932_v26 = vmul.f32 %v2490_v10, %v2490_v10 }
  0x70   : > { %943 = vadd.xlane.f32.xlu0 %v932_v26 }
  0x71   : > { %1856 = vmatpush.bf16.msra.mxu2 %v1843_v34  ;;  %1175 = vmatpush.bf16.msra.mxu0 %v1843_v34 }
  0x75   : > { %1857 = vmatpush.bf16.msra.mxu2 %v1842_v2  ;;  %1176 = vmatpush.bf16.msra.mxu0 %v1842_v2 }
  0x79   : > { %1858 = vmatpush.bf16.msra.mxu2 %v1841_v43  ;;  %1177 = vmatpush.bf16.msra.mxu0 %v1841_v43 }
  0x7d   : > { %1859 = vmatpush.bf16.msra.mxu2 %v1840_v49  ;;  %1178 = vmatpush.bf16.msra.mxu0 %v1840_v49 }
  0x81   : > { %1860 = vmatpush.bf16.msra.mxu2 %v1839_v4  ;;  %1179 = vmatpush.bf16.msra.mxu0 %v1839_v4 }
  0x85   : > { %1861 = vmatpush.bf16.msra.mxu2 %v1838_v5  ;;  %1180 = vmatpush.bf16.msra.mxu0 %v1838_v5 }
  0x98   : > { %v914_v47 = vpop.xlane.xlu0 %913 }
  0x99   : > { %v925_v59 = vmul.f32 0.125, %v914_v47 }
  0x9a   : > { %v946_v25 = vpop.xlane.xlu1 %945 }
  0x9b   : > { %v973_v27 = vmul.f32 %v925_v59, %v925_v59  ;;  %v957_v53 = vmul.f32 0.125, %v946_v25  ;;  %v965_v62 = vsub.f32 %v2208_v48, %v925_v59 }
  0x9d   : > { %v981_v28 = vsub.f32 %v957_v53, %v973_v27 }
  0x9f   : > { %v989_v30 = vadd.f32 1e-06, %v981_v28 }
  0xa1   : > { %1912 = vrsqrt.f32 %v989_v30  ;;  %v906_v42 = vpop.xlane.xlu2 %905  ;;  %vm1039_vm3 = vweird.f32 %v989_v30 }
  0xa2   : > { %v2528_v7 = vmul.f32 0.125, %v906_v42 }
  0xa4   : > { %v969_v24 = vmul.f32 %v2528_v7, %v2528_v7 }
  0xa7   : > { %v1913_v22 = vpop.eup %1912 }
  0xa8   : > { %v1034_v31 = vmul.f32 %v1913_v22, %v989_v30  ;;  %vm1040_vm2 = vweird.f32 %v1913_v22 }
  0xa9   : > { %vm1041_vm4 = vmor %vm1039_vm3, %vm1040_vm2 }
  0xaa   : > { %v1035_v1 = vmul.f32 %v1913_v22, %v1034_v31 }
  0xac   : > { %v916_v32 = vpop.xlane.xlu0 %915  ;;  %v1036_v41 = vmul.f32 0.5, %v1035_v1 }
  0xad   : > { %v926_v33 = vmul.f32 0.125, %v916_v32 }
  0xae   : > { %v948_v36 = vpop.xlane.xlu1 %947  ;;  %v1037_v46 = vsub.f32 1.5, %v1036_v41 }
  0xaf   : > { %v974_v0 = vmul.f32 %v926_v33, %v926_v33  ;;  %v958_v37 = vmul.f32 0.125, %v948_v36  ;;  %v966_v13 = vsub.f32 %v2294_v50, %v926_v33 }
  0xb0   : > { %v1038_v40 = vmul.f32 %v1913_v22, %v1037_v46 }
  0xb1   : > { %v982_v35 = vsub.f32 %v958_v37, %v974_v0 }
  0xb2   : > { %v1042_v60 = vsel %vm1041_vm4, %v1913_v22, %v1038_v40 }
  0xb3   : > { %v990_v38 = vadd.f32 1e-06, %v982_v35  ;;  %v1077_v18 = vmul.f32 %v1042_v60, %v965_v62 }
  0xb5   : > { %1914 = vrsqrt.f32 %v990_v38  ;;  %vm1049_vm6 = vweird.f32 %v990_v38  ;;  %v1087_v20 = vmul.f32 %v2523_v11, %v1077_v18 }
  0xb6   : > { %v908_v55 = vpop.xlane.xlu2 %907 }
  0xb7   : > { %v2516_v57 = vmul.f32 0.125, %v908_v55  ;;  %v1097_v47 = vadd.f32 %v2532_v61, %v1087_v20 }
  0xb9   : > { %v970_v45 = vmul.f32 %v2516_v57, %v2516_v57  ;;  %v962_v62 = vsub.f32 %v2339_v56, %v2516_v57 }
  0xbb   : > { %v1915_v3 = vpop.eup %1914 }
  0xbc   : > { %v1044_v54 = vmul.f32 %v1915_v3, %v990_v38  ;;  %vm1050_vm5 = vweird.f32 %v1915_v3 }
  0xbd   : > { %vm1051_vm7 = vmor %vm1049_vm6, %vm1050_vm5 }
  0xbe   : > { %v1045_v51 = vmul.f32 %v1915_v3, %v1044_v54 }
  0xc0   : > { %v1046_v58 = vmul.f32 0.5, %v1045_v51 }
  0xc1   : > { %v920_v63 = vpop.xlane.xlu0 %919 }
  0xc2   : > { %v1047_v44 = vsub.f32 1.5, %v1046_v58  ;;  %v2543_v31 = vmul.f32 0.125, %v920_v63 }
  0xc3   : > { %v940_v52 = vpop.xlane.xlu1 %939 }
  0xc4   : > { %v1048_v6 = vmul.f32 %v1915_v3, %v1047_v44  ;;  %v954_v48 = vmul.f32 0.125, %v940_v52  ;;  %v976_v37 = vmul.f32 %v2543_v31, %v2543_v31 }
  0xc6   : > { %v978_v8 = vsub.f32 %v954_v48, %v970_v45  ;;  %v1052_v21 = vsel %vm1051_vm7, %v1915_v3, %v1048_v6 }
  0xc7   : > { %v1078_v19 = vmul.f32 %v1052_v21, %v966_v13  ;;  %v961_v13 = vsub.f32 %v2246_v39, %v2528_v7 }
  0xc8   : > { %v986_v9 = vadd.f32 1e-06, %v978_v8 }
  0xc9   : > { %v938_v23 = vpop.xlane.xlu0 %937  ;;  %v1088_v12 = vmul.f32 %v2523_v11, %v1078_v19 }
  0xca   : > { %1916 = vrsqrt.f32 %v986_v9  ;;  %v953_v26 = vmul.f32 0.125, %v938_v23  ;;  %vm1009_vm9 = vweird.f32 %v986_v9 }
  0xcb   : > { %v918_v50 = vpop.xlane.xlu2 %917  ;;  %v1098_v59 = vadd.f32 %v2532_v61, %v1088_v12 }
  0xcc   : > { %v2539_v25 = vmul.f32 0.125, %v918_v50  ;;  %v977_v27 = vsub.f32 %v953_v26, %v969_v24 }
  0xcd   : > { %v950_v53 = vpop.xlane.xlu1 %949  ;;  %v1103_v28 = vpack.c.bf16 %v1098_v59, %v1097_v47 }
  0xce   : > { %v975_v30 = vmul.f32 %v2539_v25, %v2539_v25  ;;  %v985_v14 = vadd.f32 1e-06, %v977_v27  ;;  %v959_v29 = vmul.f32 0.125, %v950_v53  ;;  %v967_v50 = vsub.f32 %v2428_v15, %v2539_v25 }
  0xcf   : > { %1191 = vmatmul.bf16.vlgmr.msra.gmra.mxu2 %v1103_v28  ;;  %v968_v25 = vsub.f32 %v2379_v17, %v2543_v31 }
  0xd0   : > { %v1917_v22 = vpop.eup %1916  ;;  %1918 = vrsqrt.f32 %v985_v14  ;;  %v983_v32 = vsub.f32 %v959_v29, %v975_v30  ;;  %vm999_vm12 = vweird.f32 %v985_v14 }
  0xd1   : > { %v1004_v33 = vmul.f32 %v1917_v22, %v986_v9  ;;  %vm1010_vm8 = vweird.f32 %v1917_v22 }
  0xd2   : > { %v991_v34 = vadd.f32 1e-06, %v983_v32  ;;  %vm1011_vm10 = vmor %vm1009_vm9, %vm1010_vm8 }
  0xd3   : > { %v1005_v36 = vmul.f32 %v1917_v22, %v1004_v33  ;;  %v952_v0 = vpop.xlane.xlu2 %951 }
  0xd4   : > { %v960_v1 = vmul.f32 0.125, %v952_v0  ;;  %1920 = vrsqrt.f32 %v991_v34  ;;  %vm1059_vm15 = vweird.f32 %v991_v34 }
  0xd5   : > { %v1006_v35 = vmul.f32 0.5, %v1005_v36 }
  0xd6   : > { %v1919_v2 = vpop.eup %1918  ;;  %v984_v38 = vsub.f32 %v960_v1, %v976_v37 }
  0xd7   : > { %v1007_v41 = vsub.f32 1.5, %v1006_v35  ;;  %v994_v42 = vmul.f32 %v1919_v2, %v985_v14  ;;  %v910_v43 = vpop.xlane.xlu0 %909  ;;  %vm1000_vm11 = vweird.f32 %v1919_v2 }
  0xd8   : > { %v992_v46 = vadd.f32 1e-06, %v984_v38  ;;  %v2547_v49 = vmul.f32 0.125, %v910_v43  ;;  %vm1001_vm13 = vmor %vm999_vm12, %vm1000_vm11 }
  0xd9   : > { %v1008_v3 = vmul.f32 %v1917_v22, %v1007_v41  ;;  %v995_v40 = vmul.f32 %v1919_v2, %v994_v42 }
  0xda   : > { %v1921_v54 = vpop.eup %1920  ;;  %1922 = vrsqrt.f32 %v992_v46  ;;  %v971_v4 = vmul.f32 %v2547_v49, %v2547_v49  ;;  %vm1069_vm2 = vweird.f32 %v992_v46 }
  0xdb   : > { %v996_v51 = vmul.f32 0.5, %v995_v40  ;;  %v1054_v55 = vmul.f32 %v1921_v54, %v991_v34  ;;  %v942_v58 = vpop.xlane.xlu2 %941  ;;  %v1012_v60 = vsel %vm1011_vm10, %v1917_v22, %v1008_v3  ;;  %vm1060_vm14 = vweird.f32 %v1921_v54 }
  0xdc   : > { %v955_v63 = vmul.f32 0.125, %v942_v58  ;;  %v1074_v18 = vmul.f32 %v1012_v60, %v962_v62  ;;  %vm1061_vm0 = vmor %vm1059_vm15, %vm1060_vm14 }
  0xdd   : > { %v997_v5 = vsub.f32 1.5, %v996_v51  ;;  %v1055_v44 = vmul.f32 %v1921_v54, %v1054_v55 }
  0xde   : > { %v979_v52 = vsub.f32 %v955_v63, %v971_v4  ;;  %v1084_v23 = vmul.f32 %v2523_v11, %v1074_v18  ;;  %v963_v4 = vsub.f32 %v2476_v16, %v2547_v49  ;;  %v2577_v16 = vld [vmem:[%s2790_s5] ss:$0 sm:$0xff] }
  0xdf   : > { %v998_v45 = vmul.f32 %v1919_v2, %v997_v5  ;;  %v1056_v6 = vmul.f32 0.5, %v1055_v44 }
  0xe0   : > { %v1923_v48 = vpop.eup %1922  ;;  %v987_v8 = vadd.f32 1e-06, %v979_v52  ;;  %v1094_v30 = vadd.f32 %v2532_v61, %v1084_v23 }
  0xe1   : > { %v1064_v21 = vmul.f32 %v1923_v48, %v992_v46  ;;  %v1057_v19 = vsub.f32 1.5, %v1056_v6  ;;  %v912_v20 = vpop.xlane.xlu1 %911  ;;  %v1002_v56 = vsel %vm1001_vm13, %v1919_v2, %v998_v45  ;;  %vm1070_vm1 = vweird.f32 %v1923_v48 }
  0xe2   : > { %1924 = vrsqrt.f32 %v987_v8  ;;  %v924_v57 = vmul.f32 0.125, %v912_v20  ;;  %v1073_v9 = vmul.f32 %v1002_v56, %v961_v13  ;;  %vm1071_vm3 = vmor %vm1069_vm2, %vm1070_vm1  ;;  %vm1019_vm5 = vweird.f32 %v987_v8  ;;  %v1853_v20 = vld [vmem:[%s2792_s7 + $0x38] sm:$0xff] }
  0xe3   : > { %v1065_v12 = vmul.f32 %v1923_v48, %v1064_v21  ;;  %v1058_v24 = vmul.f32 %v1921_v54, %v1057_v19  ;;  %v944_v26 = vpop.xlane.xlu0 %943  ;;  %1862 = vmatpush.bf16.msra.mxu3 %v1853_v20  ;;  %1480 = vmatpush.bf16.msra.mxu1 %v1853_v20  ;;  %vm1510_vm2 = vcmask 1047556  }
  0xe4   : > { %v972_v39 = vmul.f32 %v924_v57, %v924_v57  ;;  %v956_v7 = vmul.f32 0.125, %v944_v26  ;;  %v1083_v47 = vmul.f32 %v2523_v11, %v1073_v9  ;;  %v964_v60 = vsub.f32 %v2490_v10, %v924_v57 }
  0xe5   : > { %v1066_v59 = vmul.f32 0.5, %v1065_v12  ;;  %v1062_v27 = vsel %vm1061_vm0, %v1921_v54, %v1058_v24  ;;  %v1852_v12 = vld [vmem:[%s2792_s7 + $0x30] sm:$0xff] }
  0xe6   : > { %v980_v53 = vsub.f32 %v956_v7, %v972_v39  ;;  %v1093_v28 = vadd.f32 %v2532_v61, %v1083_v47  ;;  %v1079_v14 = vmul.f32 %v1062_v27, %v967_v50  ;;  %v1851_v47 = vld [vmem:[%s2792_s7 + $0x28] sm:$0xff] }
  0xe7   : > { %v1067_v29 = vsub.f32 1.5, %v1066_v59  ;;  %1863 = vmatpush.bf16.msra.mxu3 %v1852_v12  ;;  %1481 = vmatpush.bf16.msra.mxu1 %v1852_v12 }
  0xe8   : > { %v1925_v22 = vpop.eup %1924  ;;  %v988_v32 = vadd.f32 1e-06, %v980_v53  ;;  %v1101_v33 = vpack.c.bf16 %v1094_v30, %v1093_v28  ;;  %v1089_v36 = vmul.f32 %v2523_v11, %v1079_v14 }
  0xe9   : > { %v1068_v34 = vmul.f32 %v1923_v48, %v1067_v29  ;;  %v1014_v15 = vmul.f32 %v1925_v22, %v987_v8  ;;  %vm1020_vm4 = vweird.f32 %v1925_v22 }
  0xea   : > { %1926 = vrsqrt.f32 %v988_v32  ;;  %1181 = vmatmul.bf16.vlgmr.msra.gmra.mxu0 %v1101_v33  ;;  %v1099_v38 = vadd.f32 %v2532_v61, %v1089_v36  ;;  %vm1021_vm6 = vmor %vm1019_vm5, %vm1020_vm4  ;;  %vm1029_vm8 = vweird.f32 %v988_v32 }
  0xeb   : > { %v1015_v0 = vmul.f32 %v1925_v22, %v1014_v15  ;;  %v1072_v37 = vsel %vm1071_vm3, %v1923_v48, %v1068_v34  ;;  %1864 = vmatpush.bf16.msra.mxu3 %v1851_v47  ;;  %1482 = vmatpush.bf16.msra.mxu1 %v1851_v47 }
  0xec   : > { %v1080_v1 = vmul.f32 %v1072_v37, %v968_v25 }
  0xed   : > { %v1016_v35 = vmul.f32 0.5, %v1015_v0 }
  0xee   : > { %v1090_v2 = vmul.f32 %v2523_v11, %v1080_v1 }
  0xef   : > { %v1017_v41 = vsub.f32 1.5, %v1016_v35  ;;  %v1849_v35 = vld [vmem:[%s2792_s7 + $0x18] sm:$0xff] }
  0xf0   : > { %v1927_v42 = vpop.eup %1926  ;;  %v1100_v43 = vadd.f32 %v2532_v61, %v1090_v2 }
  0xf1   : > { %v1018_v46 = vmul.f32 %v1925_v22, %v1017_v41  ;;  %v1024_v17 = vmul.f32 %v1927_v42, %v988_v32  ;;  %vm1030_vm7 = vweird.f32 %v1927_v42 }
  0xf2   : > { %v1104_v31 = vpack.c.bf16 %v1100_v43, %v1099_v38  ;;  %vm1031_vm9 = vmor %vm1029_vm8, %vm1030_vm7 }
  0xf3   : > { %v1025_v3 = vmul.f32 %v1927_v42, %v1024_v17  ;;  %v1022_v54 = vsel %vm1021_vm6, %v1925_v22, %v1018_v46  ;;  %v1850_v22 = vld [vmem:[%s2792_s7 + $0x20] sm:$0xff] }
  0xf4   : > { %1196 = vmatmul.bf16.gmra.mxu2 %v1104_v31  ;;  %v1075_v55 = vmul.f32 %v1022_v54, %v963_v4  ;;  %1865 = vmatpush.bf16.msra.mxu3 %v1850_v22  ;;  %v1848_v31 = vld [vmem:[%s2792_s7 + $0x10] sm:$0xff] }
  0xf5   : > { %v1026_v40 = vmul.f32 0.5, %v1025_v3  ;;  %1483 = vmatpush.bf16.msra.mxu1 %v1850_v22 }
  0xf6   : > { %v1085_v5 = vmul.f32 %v2523_v11, %v1075_v55 }
  0xf7   : > { %v1027_v51 = vsub.f32 1.5, %v1026_v40 }
  0xf8   : > { %v1095_v52 = vadd.f32 %v2532_v61, %v1085_v5  ;;  %1866 = vmatpush.bf16.msra.mxu3 %v1849_v35 }
  0xf9   : > { %v1028_v58 = vmul.f32 %v1927_v42, %v1027_v51  ;;  %1484 = vmatpush.bf16.msra.mxu1 %v1849_v35  ;;  %v1847_v51 = vld [vmem:[%s2792_s7 + $0x8] sm:$0xff] }
  0xfb   : > { %v1032_v62 = vsel %vm1031_vm9, %v1927_v42, %v1028_v58 }
  0xfc   : > { %v1076_v63 = vmul.f32 %v1032_v62, %v964_v60  ;;  %1867 = vmatpush.bf16.msra.mxu3 %v1848_v31 }
  0xfd   : > { %1485 = vmatpush.bf16.msra.mxu1 %v1848_v31 }
  0xfe   : > { %v1086_v44 = vmul.f32 %v2523_v11, %v1076_v63 }
 0x100   : > { %v1096_v18 = vadd.f32 %v2532_v61, %v1086_v44  ;;  %1868 = vmatpush.bf16.msra.mxu3 %v1847_v51 }
 0x101   : > { %1486 = vmatpush.bf16.msra.mxu1 %v1847_v51 }
 0x102   : > { %v1102_v45 = vpack.c.bf16 %v1096_v18, %v1095_v52 }
 0x104   : > { %1186 = vmatmul.bf16.gmra.mxu0 %v1102_v45 }
 0x152   : > { %v1192_v49 = vpop.f32.mrf.mxu2 }
 0x153   : > { %v2580_v10 = vadd.f32 %v2577_v16, %v1192_v49  ;;  %v1846_v49 = vld [vmem:[%s2792_s7] sm:$0xff] }
 0x154   : > { %1869 = vmatpush.bf16.msra.mxu3 %v1846_v49  ;;  %1487 = vmatpush.bf16.msra.mxu1 %v1846_v49 }
 0x155   : > { %v2583_v6 = vmul.f32 0.70710677, %v2580_v10 }
 0x157   : > { %v1238_v11 = vand.u32 2147483647, %v2583_v6  ;;  %vm1222_vm10 = vcmp.ge.f32.partialorder %v2583_v6, 0.0  ;;  %v1984_v6 = vmov -1.0  }
 0x159   : > { %v1246_v48 = vmul.f32 0.3275911, %v1238_v11  ;;  %v1342_v9 = vsub.f32 0.0, %v1238_v11 }
 0x15a   : > { %v1194_v13 = vpop.f32.mrf.mxu2 }
 0x15b   : > { %v1254_v8 = vadd.f32 1.0, %v1246_v48  ;;  %v2587_v61 = vadd.f32 %v2577_v16, %v1194_v13  ;;  %v1350_v50 = vmul.f32 %v1342_v9, %v1238_v11 }
 0x15d   : > { %1928 = vrcp.f32 %v1254_v8  ;;  %v2590_v21 = vmul.f32 0.70710677, %v2587_v61  ;;  %v1362_v30 = vmul.f32 1.442695, %v1350_v50 }
 0x15f   : > { %v1239_v19 = vand.u32 2147483647, %v2590_v21  ;;  %vm1223_vm11 = vcmp.ge.f32.partialorder %v2590_v21, 0.0 }
 0x160   : > { %v1231_v47 = vsel %vm1223_vm11, 1.0, %v1984_v6 }
 0x161   : > { %v1247_v56 = vmul.f32 0.3275911, %v1239_v19  ;;  %v1343_v29 = vsub.f32 0.0, %v1239_v19 }
 0x163   : > { %v1929_v57 = vpop.eup %1928  ;;  %v1255_v23 = vadd.f32 1.0, %v1247_v56  ;;  %v1351_v37 = vmul.f32 %v1343_v29, %v1239_v19  ;;  %v1230_v19 = vsel %vm1222_vm10, 1.0, %v1984_v6 }
 0x164   : > { %v1270_v24 = vmul.f32 1.0614054, %v1929_v57 }
 0x165   : > { %1930 = vrcp.f32 %v1255_v23  ;;  %v1364_v46 = vmul.f32 1.442695, %v1351_v37  ;;  %v1207_v37 = vmul.f32 0.5, %v2587_v61 }
 0x166   : > { %v1278_v26 = vadd.f32 -1.4531521, %v1270_v24  ;;  %1932 = vpow2.f32 %v1362_v30 }
 0x167   : > { %v1182_v39 = vpop.f32.mrf.mxu0 }
 0x168   : > { %v2600_v7 = vadd.f32 %v2577_v16, %v1182_v39  ;;  %v1286_v59 = vmul.f32 %v1929_v57, %v1278_v26 }
 0x16a   : > { %v2606_v27 = vmul.f32 0.70710677, %v2600_v7  ;;  %v1294_v53 = vadd.f32 1.4214138, %v1286_v59 }
 0x16b   : > { %v1931_v28 = vpop.eup %1930 }
 0x16c   : > { %v1234_v14 = vand.u32 2147483647, %v2606_v27  ;;  %v1271_v32 = vmul.f32 1.0614054, %v1931_v28  ;;  %v1302_v33 = vmul.f32 %v1929_v57, %v1294_v53  ;;  %v1933_v3 = vpop.eup %1932  ;;  %vm1218_vm12 = vcmp.ge.f32.partialorder %v2606_v27, 0.0 }
 0x16e   : > { %v1242_v34 = vmul.f32 0.3275911, %v1234_v14  ;;  %v1279_v15 = vadd.f32 -1.4531521, %v1271_v32  ;;  %v1310_v36 = vadd.f32 -0.28449672, %v1302_v33 }
 0x16f   : > { %v1184_v25 = vpop.f32.mrf.mxu0  ;;  %v1338_v18 = vsub.f32 0.0, %v1234_v14 }
 0x170   : > { %v1250_v0 = vadd.f32 1.0, %v1242_v34  ;;  %v2613_v1 = vadd.f32 %v2577_v16, %v1184_v25  ;;  %v1287_v2 = vmul.f32 %v1931_v28, %v1279_v15  ;;  %v1318_v38 = vmul.f32 %v1929_v57, %v1310_v36 }
 0x171   : > { %v1346_v9 = vmul.f32 %v1338_v18, %v1234_v14 }
 0x172   : > { %1934 = vrcp.f32 %v1250_v0  ;;  %v2619_v41 = vmul.f32 0.70710677, %v2613_v1  ;;  %v1295_v42 = vadd.f32 1.4214138, %v1287_v2  ;;  %v1326_v43 = vadd.f32 0.2548296, %v1318_v38 }
 0x173   : > { %1936 = vpow2.f32 %v1364_v46  ;;  %v1354_v22 = vmul.f32 1.442695, %v1346_v9  ;;  %v1206_v0 = vmul.f32 0.5, %v2580_v10 }
 0x174   : > { %v2622_v17 = vand.u32 2147483647, %v2619_v41  ;;  %v1303_v40 = vmul.f32 %v1931_v28, %v1295_v42  ;;  %v1334_v54 = vmul.f32 %v1929_v57, %v1326_v43  ;;  %vm1219_vm13 = vcmp.ge.f32.partialorder %v2619_v41, 0.0 }
 0x176   : > { %v1243_v4 = vmul.f32 0.3275911, %v2622_v17  ;;  %v1311_v58 = vadd.f32 -0.28449672, %v1303_v40  ;;  %v1374_v60 = vmul.f32 %v1933_v3, %v1334_v54  ;;  %v1339_v53 = vsub.f32 0.0, %v2622_v17 }
 0x177   : > { %v1197_v55 = vpop.f32.mrf.mxu2 }
 0x178   : > { %v2631_v62 = vpop.eup %1934  ;;  %v1251_v63 = vadd.f32 1.0, %v1243_v4  ;;  %v2634_v5 = vadd.f32 %v2577_v16, %v1197_v55  ;;  %v1319_v44 = vmul.f32 %v1931_v28, %v1311_v58  ;;  %v1382_v11 = vsub.f32 1.0, %v1374_v60 }
 0x179   : > { %v1266_v52 = vmul.f32 1.0614054, %v2631_v62  ;;  %v1937_v57 = vpop.eup %1936  ;;  %v1347_v2 = vmul.f32 %v1339_v53, %v2622_v17 }
 0x17a   : > { %1938 = vrcp.f32 %v1251_v63  ;;  %v2639_v45 = vmul.f32 0.70710677, %v2634_v5  ;;  %v1327_v48 = vadd.f32 0.2548296, %v1319_v44  ;;  %v1390_v12 = vmul.f32 %v1382_v11, %v1230_v19 }
 0x17b   : > { %v1274_v13 = vadd.f32 -1.4531521, %v1266_v52  ;;  %v1356_v51 = vmul.f32 1.442695, %v1347_v2 }
 0x17c   : > { %v2645_v8 = vand.u32 2147483647, %v2639_v45  ;;  %v1335_v20 = vmul.f32 %v1931_v28, %v1327_v48  ;;  %v1398_v33 = vadd.f32 1.0, %v1390_v12  ;;  %vm1224_vm14 = vcmp.ge.f32.partialorder %v2639_v45, 0.0 }
 0x17d   : > { %v1282_v56 = vmul.f32 %v2631_v62, %v1274_v13 }
 0x17e   : > { %v1248_v23 = vmul.f32 0.3275911, %v2645_v8  ;;  %v1375_v26 = vmul.f32 %v1937_v57, %v1335_v20  ;;  %v1406_v40 = vmul.f32 %v1398_v33, %v1206_v0  ;;  %v1344_v63 = vsub.f32 0.0, %v2645_v8 }
 0x17f   : > { %v1199_v24 = vpop.f32.mrf.mxu2  ;;  %v1290_v50 = vadd.f32 1.4214138, %v1282_v56 }
 0x180   : > { %v2651_v39 = vpop.eup %1938  ;;  %v1256_v59 = vadd.f32 1.0, %v1248_v23  ;;  %v2655_v21 = vadd.f32 %v2577_v16, %v1199_v24  ;;  %v1383_v30 = vsub.f32 1.0, %v1375_v26 }
 0x181   : > { %v1187_v28 = vpop.f32.mrf.mxu0  ;;  %v1267_v14 = vmul.f32 1.0614054, %v2651_v39  ;;  %v1298_v29 = vmul.f32 %v2631_v62, %v1290_v50 }
 0x182   : > { %1940 = vrcp.f32 %v1256_v59  ;;  %v2661_v32 = vadd.f32 %v2577_v16, %v1187_v28  ;;  %v2664_v34 = vmul.f32 0.70710677, %v2655_v21  ;;  %v1391_v15 = vmul.f32 %v1383_v30, %v1231_v47 }
 0x183   : > { %v1275_v25 = vadd.f32 -1.4531521, %v1267_v14  ;;  %v1306_v36 = vadd.f32 -0.28449672, %v1298_v29  ;;  %1942 = vpow2.f32 %v1354_v22  ;;  %v1226_v14 = vsel %vm1218_vm12, 1.0, %v1984_v6 }
 0x184   : > { %v2669_v35 = vmul.f32 0.70710677, %v2661_v32  ;;  %v1241_v38 = vand.u32 2147483647, %v2664_v34  ;;  %v1399_v42 = vadd.f32 1.0, %v1391_v15  ;;  %vm1225_vm15 = vcmp.ge.f32.partialorder %v2664_v34, 0.0 }
 0x185   : > { %v1283_v43 = vmul.f32 %v2651_v39, %v1275_v25  ;;  %v1314_v31 = vmul.f32 %v2631_v62, %v1306_v36 }
 0x186   : > { %v1236_v46 = vand.u32 2147483647, %v2669_v35  ;;  %v1249_v3 = vmul.f32 0.3275911, %v1241_v38  ;;  %v1407_v10 = vmul.f32 %v1399_v42, %v1207_v37  ;;  %vm1220_vm0 = vcmp.ge.f32.partialorder %v2669_v35, 0.0 }
 0x187   : > { %v1291_v4 = vadd.f32 1.4214138, %v1283_v43  ;;  %v1322_v60 = vadd.f32 0.2548296, %v1314_v31 }
 0x188   : > { %v2676_v54 = vpop.eup %1940  ;;  %v1244_v61 = vmul.f32 0.3275911, %v1236_v46  ;;  %v1257_v55 = vadd.f32 1.0, %v1249_v3  ;;  %v1412_v58 = vpack.c.bf16 %v1407_v10, %v1406_v40  ;;  %v1340_v28 = vsub.f32 0.0, %v1236_v46 }
 0x189   : > { %v1189_v17 = vpop.f32.mrf.mxu0  ;;  %v1299_v18 = vmul.f32 %v2651_v39, %v1291_v4  ;;  %v1330_v49 = vmul.f32 %v2631_v62, %v1322_v60  ;;  %v1272_v11 = vmul.f32 1.0614054, %v2676_v54  ;;  %v1943_v48 = vpop.eup %1942  ;;  %v1345_v62 = vsub.f32 0.0, %v1241_v38 }
 0x18a   : > { %v1252_v44 = vadd.f32 1.0, %v1244_v61  ;;  %v2680_v52 = vadd.f32 %v2577_v16, %v1189_v17  ;;  %1944 = vrcp.f32 %v1257_v55  ;;  %1498 = vmatmul.bf16.vlgmr.msra.gmra.mxu3 %v1412_v58  ;;  %v1352_v16 = vmul.f32 %v1344_v63, %v2645_v8 }
 0x18b   : > { %v1307_v19 = vadd.f32 -0.28449672, %v1299_v18  ;;  %v1370_v20 = vmul.f32 %v1943_v48, %v1330_v49  ;;  %v1280_v56 = vadd.f32 -1.4531521, %v1272_v11  ;;  %v1353_v15 = vmul.f32 %v1345_v62, %v1241_v38 }
 0x18c   : > { %1946 = vrcp.f32 %v1252_v44  ;;  %v2686_v13 = vmul.f32 0.70710677, %v2680_v52  ;;  %v1366_v53 = vmul.f32 1.442695, %v1352_v16  ;;  %v1348_v42 = vmul.f32 %v1340_v28, %v1236_v46 }
 0x18d   : > { %1948 = vpow2.f32 %v1356_v51  ;;  %v1315_v9 = vmul.f32 %v2651_v39, %v1307_v19  ;;  %v1288_v23 = vmul.f32 %v2676_v54, %v1280_v56  ;;  %v1378_v24 = vsub.f32 1.0, %v1370_v20 }
 0x18e   : > { %v1237_v57 = vand.u32 2147483647, %v2686_v13  ;;  %v1227_v40 = vsel %vm1219_vm13, 1.0, %v1984_v6  ;;  %v1368_v38 = vmul.f32 1.442695, %v1353_v15  ;;  %v1202_v4 = vmul.f32 0.5, %v2600_v7 }
 0x18f   : > { %v1323_v50 = vadd.f32 0.2548296, %v1315_v9  ;;  %v1296_v47 = vadd.f32 1.4214138, %v1288_v23  ;;  %v1386_v25 = vmul.f32 %v1378_v24, %v1226_v14  ;;  %v1203_v46 = vmul.f32 0.5, %v2613_v1 }
 0x190   : > { %v1245_v12 = vmul.f32 0.3275911, %v1237_v57  ;;  %v2693_v26 = vpop.eup %1944  ;;  %v1358_v58 = vmul.f32 1.442695, %v1348_v42  ;;  %v1341_v60 = vsub.f32 0.0, %v1237_v57  ;;  %v1232_v14 = vsel %vm1224_vm14, 1.0, %v1984_v6 }
 0x191   : > { %v1273_v30 = vmul.f32 1.0614054, %v2693_v26  ;;  %v1331_v29 = vmul.f32 %v2651_v39, %v1323_v50  ;;  %v1304_v27 = vmul.f32 %v2676_v54, %v1296_v47  ;;  %v1394_v10 = vadd.f32 1.0, %v1386_v25 }
 0x192   : > { %v2695_v59 = vpop.eup %1946  ;;  %v1253_v8 = vadd.f32 1.0, %v1245_v12  ;;  %v1349_v1 = vmul.f32 %v1341_v60, %v1237_v57  ;;  %vm1221_vm1 = vcmp.ge.f32.partialorder %v2686_v13, 0.0 }
 0x193   : > { %v1268_v22 = vmul.f32 1.0614054, %v2695_v59  ;;  %v1949_v33 = vpop.eup %1948  ;;  %v1281_v36 = vadd.f32 -1.4531521, %v1273_v30  ;;  %v1312_v37 = vadd.f32 -0.28449672, %v1304_v27  ;;  %v1402_v19 = vmul.f32 %v1394_v10, %v1202_v4 }
 0x194   : > { %1950 = vrcp.f32 %v1253_v8  ;;  %v1371_v0 = vmul.f32 %v1949_v33, %v1331_v29  ;;  %v1360_v8 = vmul.f32 1.442695, %v1349_v1  ;;  %v1229_v35 = vsel %vm1221_vm1, 1.0, %v1984_v6 }
 0x195   : > { %v1276_v2 = vadd.f32 -1.4531521, %v1268_v22  ;;  %1952 = vpow2.f32 %v1366_v53  ;;  %v1289_v43 = vmul.f32 %v2693_v26, %v1281_v36  ;;  %v1320_v39 = vmul.f32 %v2676_v54, %v1312_v37 }
 0x196   : > { %v1379_v31 = vsub.f32 1.0, %v1371_v0  ;;  %1954 = vpow2.f32 %v1368_v38  ;;  %v1233_v36 = vsel %vm1225_vm15, 1.0, %v1984_v6 }
 0x197   : > { %v1284_v3 = vmul.f32 %v2695_v59, %v1276_v2  ;;  %v1297_v61 = vadd.f32 1.4214138, %v1289_v43  ;;  %v1328_v51 = vadd.f32 0.2548296, %v1320_v39  ;;  %1956 = vpow2.f32 %v1358_v58 }
 0x198   : > { %v1387_v41 = vmul.f32 %v1379_v31, %v1227_v40  ;;  %1958 = vpow2.f32 %v1360_v8  ;;  %v1209_v43 = vmul.f32 0.5, %v2655_v21  ;;  %v1204_v21 = vmul.f32 0.5, %v2661_v32 }
 0x199   : > { %v1292_v55 = vadd.f32 1.4214138, %v1284_v3  ;;  %v1305_v63 = vmul.f32 %v2693_v26, %v1297_v61  ;;  %v1336_v18 = vmul.f32 %v2676_v54, %v1328_v51  ;;  %v1228_v3 = vsel %vm1220_vm0, 1.0, %v1984_v6  ;;  %v1911_v6 = vld [vmem:[%s2789_s4 + $0x1] ss:$0 sm:$0xff] }
 0x19a   : > { %v1951_v17 = vpop.eup %1950  ;;  %v1395_v44 = vadd.f32 1.0, %v1387_v41 }
 0x19b   : > { %v1269_v49 = vmul.f32 1.0614054, %v1951_v17  ;;  %v1300_v11 = vmul.f32 %v2695_v59, %v1292_v55  ;;  %v1953_v48 = vpop.eup %1952  ;;  %v1313_v7 = vadd.f32 -0.28449672, %v1305_v63  ;;  %v1205_v55 = vmul.f32 0.5, %v2680_v52 }
 0x19c   : > { %v1403_v20 = vmul.f32 %v1395_v44, %v1203_v46  ;;  %v1376_v56 = vmul.f32 %v1953_v48, %v1336_v18  ;;  %v1955_v28 = vpop.eup %1954  ;;  %v1985_v48 = vmov 1983009808  }
 0x19d   : > { %v1277_v16 = vadd.f32 -1.4531521, %v1269_v49  ;;  %v1308_v9 = vadd.f32 -0.28449672, %v1300_v11  ;;  %v1321_v23 = vmul.f32 %v2693_v26, %v1313_v7  ;;  %v1957_v27 = vpop.eup %1956 }
 0x19e   : > { %v1410_v62 = vpack.c.bf16 %v1403_v20, %v1402_v19  ;;  %v1384_v50 = vsub.f32 1.0, %v1376_v56  ;;  %v1959_v39 = vpop.eup %1958  ;;  %v1515_v19 = vunpack.c.l.s4 %v1985_v48 }
 0x19f   : > { %v1285_v12 = vmul.f32 %v1951_v17, %v1277_v16  ;;  %v1316_v24 = vmul.f32 %v2695_v59, %v1308_v9  ;;  %v1329_v54 = vadd.f32 0.2548296, %v1321_v23 }
 0x1a0   : > { %1488 = vmatmul.bf16.vlgmr.msra.gmra.mxu1 %v1410_v62  ;;  %v1392_v33 = vmul.f32 %v1384_v50, %v1232_v14  ;;  %v1516_v16 = vunpack.c.0.s8 %v1515_v19  ;;  %v1624_v19 = vld [vmem:[%s2749_s22 + $0x10] sm:$0xff] }
 0x1a1   : > { %v1293_v47 = vadd.f32 1.4214138, %v1285_v12  ;;  %v1324_v53 = vadd.f32 0.2548296, %v1316_v24  ;;  %v1337_v30 = vmul.f32 %v2693_v26, %v1329_v54  ;;  %v1986_v24 = vmov 1934713408  }
 0x1a2   : > { %v1400_v2 = vadd.f32 1.0, %v1392_v33  ;;  %v1563_v54 = vunpack.c.l.s4 %v1986_v24 }
 0x1a3   : > { %v1301_v57 = vmul.f32 %v1951_v17, %v1293_v47  ;;  %v1332_v29 = vmul.f32 %v2695_v59, %v1324_v53  ;;  %v1377_v22 = vmul.f32 %v1955_v28, %v1337_v30  ;;  %v1208_v59 = vmul.f32 0.5, %v2634_v5 }
 0x1a4   : > { %v1564_v33 = vunpack.c.0.s8 %v1563_v54  ;;  %v1623_v54 = vld [vmem:[%s2749_s22 + $0x8] sm:$0xff] }
 0x1a5   : > { %v1309_v45 = vadd.f32 -0.28449672, %v1301_v57  ;;  %v1372_v15 = vmul.f32 %v1957_v27, %v1332_v29  ;;  %v1385_v25 = vsub.f32 1.0, %v1377_v22  ;;  %v1408_v40 = vmul.f32 %v1400_v2, %v1208_v59 }
 0x1a7   : > { %v1317_v0 = vmul.f32 %v1951_v17, %v1309_v45  ;;  %v1393_v37 = vmul.f32 %v1385_v25, %v1233_v36  ;;  %v1380_v42 = vsub.f32 1.0, %v1372_v15 }
 0x1a9   : > { %v1325_v26 = vadd.f32 0.2548296, %v1317_v0  ;;  %v1401_v34 = vadd.f32 1.0, %v1393_v37  ;;  %v1388_v61 = vmul.f32 %v1380_v42, %v1228_v3 }
 0x1ab   : > { %v1333_v31 = vmul.f32 %v1951_v17, %v1325_v26  ;;  %v1409_v38 = vmul.f32 %v1401_v34, %v1209_v43  ;;  %v1396_v5 = vadd.f32 1.0, %v1388_v61 }
 0x1ad   : > { %v1373_v10 = vmul.f32 %v1959_v39, %v1333_v31  ;;  %v1413_v4 = vpack.c.bf16 %v1409_v38, %v1408_v40  ;;  %v1404_v46 = vmul.f32 %v1396_v5, %v1204_v21 }
 0x1af   : > { %v1381_v41 = vsub.f32 1.0, %v1373_v10  ;;  %1503 = vmatmul.bf16.gmra.mxu3 %v1413_v4 }
 0x1b1   : > { %v1389_v51 = vmul.f32 %v1381_v41, %v1229_v35 }
 0x1b3   : > { %v1397_v17 = vadd.f32 1.0, %v1389_v51 }
 0x1b5   : > { %v1405_v58 = vmul.f32 %v1397_v17, %v1205_v55 }
 0x1b7   : > { %v1411_v60 = vpack.c.bf16 %v1405_v58, %v1404_v46 }
 0x1b9   : > { %1493 = vmatmul.bf16.gmra.mxu1 %v1411_v60 }
 0x20d   : > { %v1499_v63 = vpop.f32.mrf.mxu3 }
 0x20e   : > { %v1500_v49 = vadd.f32 %v1911_v6, %v1499_v63 }
 0x210   : > { %v1536_v52 = vrot.slane %v1500_v49, 4 }
 0x215   : > { %v1501_v44 = vpop.f32.mrf.mxu3 }
 0x216   : > { %v1502_v1 = vadd.f32 %v1911_v6, %v1501_v44 }
 0x218   : > { %v1548_v8 = vrot.slane %v1502_v1, 4 }
 0x21d   : > { %v1489_v13 = vpop.f32.mrf.mxu1 }
 0x21e   : > { %v1490_v56 = vadd.f32 %v1911_v6, %v1489_v13 }
 0x220   : > { %v1512_v50 = vrot.slane %v1490_v56, 4 }
 0x225   : > { %v1491_v18 = vpop.f32.mrf.mxu1 }
 0x226   : > { %v1492_v47 = vadd.f32 %v1911_v6, %v1491_v18 }
 0x228   : > { %v1524_v15 = vrot.slane %v1492_v47, 4 }
 0x232   : > { %v1504_v11 = vpop.f32.mrf.mxu3 }
 0x233   : > { %v1505_v32 = vadd.f32 %v1911_v6, %v1504_v11 }
 0x235   : > { %v1534_v7 = vrot.slane %v1505_v32, 4  ;;  %v1537_v23 = vsel %vm1510_vm2, %v1505_v32, %v1536_v52 }
 0x236   : > { %v1494_v20 = vpop.f32.mrf.mxu1  ;;  %v1545_v53 = vperm.slane %v1537_v23, %v1516_v16  ;;  %v1626_v23 = vld [vmem:[%s2749_s22 + $0x20] sm:$0xff] }
 0x237   : > { %v1495_v9 = vadd.f32 %v1911_v6, %v1494_v20  ;;  %v1535_v62 = vsel %vm1510_vm2, %v1534_v7, %v1500_v49  ;;  %v1622_v7 = vld [vmem:[%s2749_s22] sm:$0xff] }
 0x238   : > { %v1541_v30 = vperm.slane %v1535_v62, %v1516_v16  ;;  %v1596_v25 = vrot.slane %v1545_v53, 4 }
 0x239   : > { %v1509_v12 = vrot.slane %v1495_v9, 4  ;;  %v1513_v29 = vsel %vm1510_vm2, %v1495_v9, %v1512_v50 }
 0x23a   : > { %v1506_v28 = vpop.f32.mrf.mxu3  ;;  %v1584_v37 = vrot.slane %v1541_v30, 4  ;;  %v1521_v26 = vperm.slane %v1513_v29, %v1516_v16 }
 0x23b   : > { %v1507_v14 = vadd.f32 %v1911_v6, %v1506_v28  ;;  %v1511_v57 = vsel %vm1510_vm2, %v1509_v12, %v1490_v56 }
 0x23c   : > { %v1517_v2 = vperm.slane %v1511_v57, %v1516_v16  ;;  %v1572_v5 = vrot.slane %v1521_v26, 4 }
 0x23d   : > { %v1546_v27 = vrot.slane %v1507_v14, 4  ;;  %v1549_v22 = vsel %vm1510_vm2, %v1507_v14, %v1548_v8  ;;  %v1627_v8 = vld [vmem:[%s2749_s22 + $0x28] sm:$0xff] }
 0x23e   : > { %v1496_v45 = vpop.f32.mrf.mxu1  ;;  %v1557_v36 = vperm.slane %v1549_v22, %v1516_v16  ;;  %v1560_v51 = vrot.slane %v1517_v2, 4 }
 0x23f   : > { %v1497_v0 = vadd.f32 %v1911_v6, %v1496_v45  ;;  %v1547_v42 = vsel %vm1510_vm2, %v1546_v27, %v1502_v1  ;;  %v1625_v1 = vld [vmem:[%s2749_s22 + $0x18] sm:$0xff] }
 0x240   : > { %v1553_v59 = vperm.slane %v1547_v42, %v1516_v16  ;;  %v1594_v43 = vrot.slane %v1557_v36, 4  ;;  %v1597_v34 = vsel %vm1510_vm2, %v1557_v36, %v1596_v25  ;;  %v1629_v27 = vld [vmem:[%s2749_s22 + $0x38] sm:$0xff] }
 0x241   : > { %v1522_v31 = vrot.slane %v1497_v0, 4  ;;  %v1605_v39 = vperm.slane %v1597_v34, %v1564_v33  ;;  %v1525_v3 = vsel %vm1510_vm2, %v1497_v0, %v1524_v15 }
 0x242   : > { %v1582_v40 = vrot.slane %v1553_v59, 4  ;;  %v1585_v38 = vsel %vm1510_vm2, %v1553_v59, %v1584_v37  ;;  %v1595_v10 = vsel %vm1510_vm2, %v1594_v43, %v1545_v53  ;;  %v1533_v55 = vperm.slane %v1525_v3, %v1516_v16 }
 0x243   : > { %v1523_v61 = vsel %vm1510_vm2, %v1522_v31, %v1492_v47  ;;  %v1593_v4 = vperm.slane %v1585_v38, %v1564_v33  ;;  %v1601_v41 = vperm.slane %v1595_v10, %v1564_v33  ;;  %v1618_v58 = vrot.slane %v1605_v39, 4 }
 0x244   : > { %v1529_v35 = vperm.slane %v1523_v61, %v1516_v16  ;;  %v1583_v21 = vsel %vm1510_vm2, %v1582_v40, %v1541_v30  ;;  %v1570_v44 = vrot.slane %v1533_v55, 4  ;;  %v1573_v18 = vsel %vm1510_vm2, %v1533_v55, %v1572_v5  ;;  %v1628_v30 = vld [vmem:[%s2749_s22 + $0x30] sm:$0xff] }
 0x245   : > { %v1589_v17 = vperm.slane %v1583_v21, %v1564_v33  ;;  %v1610_v46 = vrot.slane %v1593_v4, 4  ;;  %v1614_v63 = vrot.slane %v1601_v41, 4  ;;  %v1581_v48 = vperm.slane %v1573_v18, %v1564_v33 }
 0x246   : > { %v1558_v60 = vrot.slane %v1529_v35, 4  ;;  %v1561_v13 = vsel %vm1510_vm2, %v1529_v35, %v1560_v51  ;;  %v1571_v52 = vsel %vm1510_vm2, %v1570_v44, %v1521_v26 }
 0x247   : > { %v1606_v6 = vrot.slane %v1589_v17, 4  ;;  %v1569_v11 = vperm.slane %v1561_v13, %v1564_v33  ;;  %v1577_v20 = vperm.slane %v1571_v52, %v1564_v33  ;;  %v1619_v9 = vsel %vm1510_vm2, %v1618_v58, %v1581_v48 }
 0x248   : > { %v1559_v49 = vsel %vm1510_vm2, %v1558_v60, %v1517_v2  ;;  %v1620_v24 = vrot.slane %v1581_v48, 4  ;;  %v1636_v36 = vadd.f32 %v1628_v30, %v1619_v9 }
 0x249   : > { %v1565_v32 = vperm.slane %v1559_v49, %v1564_v33  ;;  %v1611_v56 = vsel %vm1510_vm2, %v1610_v46, %v1569_v11  ;;  %v1612_v16 = vrot.slane %v1569_v11, 4  ;;  %v1615_v53 = vsel %vm1510_vm2, %v1614_v63, %v1577_v20 }
 0x24a   : > { %v1632_v50 = vadd.f32 %v1624_v19, %v1611_v56  ;;  %v1616_v28 = vrot.slane %v1577_v20, 4  ;;  %v1621_v29 = vsel %vm1510_vm2, %v1605_v39, %v1620_v24  ;;  %v1634_v33 = vadd.f32 %v1626_v23, %v1615_v53  ;;  %1644 = vst [vmem:[%s380_s25 + $0x30] sm:$0xff] %v1636_v36 }
 0x24b   : > { %v1607_v62 = vsel %vm1510_vm2, %v1606_v6, %v1565_v32  ;;  %v1608_v12 = vrot.slane %v1565_v32, 4  ;;  %v1613_v47 = vsel %vm1510_vm2, %v1593_v4, %v1612_v16  ;;  %v1637_v0 = vadd.f32 %v1629_v27, %v1621_v29 }
 0x24c   : > { %v1630_v14 = vadd.f32 %v1622_v7, %v1607_v62  ;;  %v1633_v22 = vadd.f32 %v1625_v1, %v1613_v47  ;;  %1640 = vst [vmem:[%s380_s25 + $0x10] sm:$0xff] %v1632_v50  ;;  %v1617_v45 = vsel %vm1510_vm2, %v1601_v41, %v1616_v28 }
 0x24d   : > { %v1609_v57 = vsel %vm1510_vm2, %v1589_v17, %v1608_v12  ;;  %v1635_v25 = vadd.f32 %v1627_v8, %v1617_v45  ;;  %1642 = vst [vmem:[%s380_s25 + $0x20] sm:$0xff] %v1634_v33 }
 0x24e   : > { %v1631_v15 = vadd.f32 %v1623_v54, %v1609_v57  ;;  %1638 = vst [vmem:[%s380_s25] sm:$0xff] %v1630_v14 }
 0x24f   : > { %1641 = vst [vmem:[%s380_s25 + $0x18] sm:$0xff] %v1633_v22 }
 0x250   : > { %1639 = vst [vmem:[%s380_s25 + $0x8] sm:$0xff] %v1631_v15 }
 0x251   : > { %1643 = vst [vmem:[%s380_s25 + $0x28] sm:$0xff] %v1635_v25 }
 0x252   : > { %1645 = vst [vmem:[%s380_s25 + $0x38] sm:$0xff] %v1637_v0 }
 0x253 PF: > { %s18_s29 = sadd.s32 1, %s1982_s29   ;;  %s2794_s27 = smov %s1978_s28 }
 0x254   : > { %p15_p5 = scmp.ge.s32.totalorder %s18_s29, 4   ;;  %s2795_s28 = smov %s2797_s30 }
 0x256   :  { %17 = sbr.rel (!%p15_p5) target bundleno = 2 (0x2), region = 90 }

</bundles_post_ra>
